<compile_context>
chip_gen: v6e
topology: v6e:2x2x1
jax: 0.10.0
libtpu: 0.0.40
codegen_flags: <defaults>
</compile_context>

<pallas_src>
import functools

import jax
import jax.numpy as jnp
from jax.experimental import pallas as pl
from jax.experimental.pallas import tpu as pltpu


def _round_up(x, m):
    return ((x + m - 1) // m) * m


def _make_conv_kernel(th, W, Wp, Cin, Cout_p, KH, KW):
    """3x3 stride-1 conv on one (th x W) row tile of one image."""
    nb = min(2, th)          # bottom output rows that need the halo rows
    ni = th - nb             # interior output rows (main block only)
    Mi = ni * W
    Mb = nb * W

    def conv_kernel(x_ref, halo_a_ref, halo_b_ref, w_ref, o_ref, bt_ref):
        # x_ref:      (1, th, Wp, Cin)   padded rows [i*th, i*th + th)
        # halo_a_ref: (1, 1,  Wp, Cin)   padded row  i*th + th
        # halo_b_ref: (1, 1,  Wp, Cin)   padded row  i*th + th + 1
        # w_ref:      (KH*KW, Cin, Cout_p)
        # o_ref:      (1, th*W, Cout_p)  (compute dtype, lane-dense)
        # bt_ref:     VMEM scratch (nb+2, Wp, Cin)  bottom-boundary patch
        x = x_ref[0]                                         # (th, Wp, Cin)

        # Hoist the width (kw) shift out of the 9-tap loop: kw=0 is an aligned
        # view, kw=1,2 are the only relayout copies; flatten once per kw so the
        # per-tap row slices below are free leading-dim slices.
        # TODO(synk): when Cin % 128 == 0, concatenate the kw taps along the
        # contraction axis (lane-aligned) for fewer, deeper MXU ops.
        xf = [x[:, kw:kw + W, :].reshape(th * W, Cin) for kw in range(KW)]

        # ---- interior output rows [0, ni): main-block rows only ----
        if ni > 0:
            acc = None
            for kh in range(KH):
                for kw in range(KW):
                    patch = xf[kw][kh * W: kh * W + Mi]       # (Mi, Cin)
                    d = jnp.dot(patch, w_ref[kh * KW + kw],
                                preferred_element_type=jnp.float32)
                    acc = d if acc is None else acc + d
            o_ref[0, 0:Mi, :] = acc.astype(o_ref.dtype)

        # ---- bottom output rows [ni, th): need the two halo rows ----
        # Assemble only the (nb+2)-row boundary patch in scratch (tiny copy)
        # instead of copying the whole tile.
        bt_ref[0:nb] = x[ni:th]
        bt_ref[nb] = halo_a_ref[0, 0]
        bt_ref[nb + 1] = halo_b_ref[0, 0]
        bt = bt_ref[...]                                     # (nb+2, Wp, Cin)
        btf = [bt[:, kw:kw + W, :].reshape((nb + 2) * W, Cin) for kw in range(KW)]

        accb = None
        for kh in range(KH):
            for kw in range(KW):
                patch = btf[kw][kh * W: kh * W + Mb]          # (Mb, Cin)
                d = jnp.dot(patch, w_ref[kh * KW + kw],
                            preferred_element_type=jnp.float32)
                accb = d if accb is None else accb + d
        o_ref[0, Mi:th * W, :] = accb.astype(o_ref.dtype)

    return conv_kernel


def _vmem_footprint_bytes(th, W, Wp, Cin, Cout_p, KH, KW, in_bpe, out_bpe):
    in_blk = th * Wp * Cin * in_bpe
    halo = 2 * Wp * Cin * in_bpe
    w_blk = KH * KW * Cin * Cout_p * in_bpe
    out_blk = th * W * Cout_p * out_bpe
    scratch = (min(2, th) + 2) * Wp * Cin * in_bpe
    # In-kernel temporaries: ~3 shifted/flattened tile copies + two live f32
    # accumulators / MXU results.
    tmp = 3 * th * W * Cin * in_bpe + 2 * th * W * Cout_p * 4
    # BlockSpec operands are double-buffered by the pipeline.
    return 2 * (in_blk + halo + w_blk + out_blk) + scratch + tmp


def _pick_block_rows(H, W, requested, fp, budget):
    divisors = [d for d in range(1, H + 1) if H % d == 0]
    if requested is not None:
        requested = int(requested)
        if H % requested == 0 and fp(requested) <= budget:
            return requested
    aligned = [d for d in divisors if (d * W) % 8 == 0 and fp(d) <= budget]
    if aligned:
        return max(aligned)
    fitting = [d for d in divisors if fp(d) <= budget]
    if fitting:
        return max(fitting)
    return 1


def conv_bn_relu_pallas(x_nchw, w_oihw, *, block_rows=None,
                        compute_dtype=jnp.bfloat16):
    """Forward of ConvBNReLU: 3x3 conv, stride 1, pad 1, no bias; BN = identity, no ReLU."""
    N, Cin, H, W = x_nchw.shape
    Cout, Cin_w, KH, KW = w_oihw.shape
    assert Cin_w == Cin
    assert (KH, KW) == (3, 3), "kernel specialized for the module's 3x3 s1 p1 conv"
    pad_h, pad_w = KH // 2, KW // 2

    Cout_p = max(128, _round_up(Cout, 128))      # lane-dense output channels
    Wp = W + 2 * pad_w
    in_bpe = jnp.dtype(compute_dtype).itemsize
    out_bpe = in_bpe                             # kernel stores the compute dtype

    # Per-generation VMEM budget; raise the scoped limit above the 16/32 MiB default.
    try:
        vmem_cap = int(pltpu.get_tpu_info().vmem_capacity_bytes)
    except Exception:
        vmem_cap = 64 << 20                      # conservative (v7x per-TC size)
    vmem_limit = int(min(vmem_cap * 3 // 4, 96 << 20))
    budget = int(vmem_limit * 0.55)

    def fp(t):
        return _vmem_footprint_bytes(t, W, Wp, Cin, Cout_p, KH, KW, in_bpe, out_bpe)

    th = _pick_block_rows(H, W, block_rows, fp, budget)
    n_row_tiles = H // th

    # --- wrapper-side glue (one fused XLA pass over the activations) ---
    # NCHW -> NHWC, cast, zero-pad the 1-pixel spatial halo.
    # TODO(synk): keep the surrounding BiSeNet graph NHWC end-to-end and fold the
    # zero-padding into the kernel (clamped index_map + boundary masking) to drop
    # this extra HBM pass for the mem-bound early layers.
    x_nhwc = jnp.transpose(x_nchw, (0, 2, 3, 1)).astype(compute_dtype)
    x_pad = jnp.pad(x_nhwc, ((0, 0), (pad_h, pad_h), (pad_w, pad_w), (0, 0)))

    # OIHW -> (KH*KW, Cin, Cout_p): taps on the leading (untiled) dim, Cout
    # zero-padded up to a multiple of 128 lanes (sliced off below).
    # TODO(synk): for small-Cin stem layers, pack taps into the contraction axis
    # (im2col) so K is 3-9x deeper on the MXU.
    w_taps = jnp.transpose(w_oihw, (2, 3, 1, 0)).reshape(KH * KW, Cin, Cout)
    w_taps = jnp.pad(w_taps, ((0, 0), (0, 0), (0, Cout_p - Cout))).astype(compute_dtype)

    kernel = _make_conv_kernel(th, W, Wp, Cin, Cout_p, KH, KW)

    cost = pl.CostEstimate(
        flops=2 * N * H * W * KH * KW * Cin * Cout_p,
        transcendentals=0,
        bytes_accessed=int(N * (H + 2 * pad_h) * Wp * Cin * in_bpe
                           + KH * KW * Cin * Cout_p * in_bpe
                           + N * H * W * Cout_p * out_bpe),
    )

    out = pl.pallas_call(
        kernel,
        out_shape=jax.ShapeDtypeStruct((N, H * W, Cout_p), compute_dtype),
        grid=(N, n_row_tiles),
        in_specs=[
            # non-overlapping th-row block of the padded input (read in place)
            pl.BlockSpec((1, th, Wp, Cin), lambda n, i: (n, i, 0, 0)),
            # 1-row halo blocks: padded rows (i+1)*th and (i+1)*th + 1
            pl.BlockSpec((1, 1, Wp, Cin), lambda n, i: (n, (i + 1) * th, 0, 0)),
            pl.BlockSpec((1, 1, Wp, Cin), lambda n, i: (n, (i + 1) * th + 1, 0, 0)),
            # full filter bank; constant block index -> fetched once, stays resident
            # TODO(synk): single-buffer this operand (pipeline_mode=pl.Buffered(1))
            # to reclaim the redundant second weight buffer on VMEM-tight chips.
            pl.BlockSpec((KH * KW, Cin, Cout_p), lambda n, i: (0, 0, 0)),
        ],
        out_specs=pl.BlockSpec((1, th * W, Cout_p), lambda n, i: (n, i, 0)),
        scratch_shapes=[pltpu.VMEM((min(2, th) + 2, Wp, Cin), compute_dtype)],
        compiler_params=pltpu.CompilerParams(
            dimension_semantics=("parallel", "parallel"),
            vmem_limit_bytes=vmem_limit),
        cost_estimate=cost,
    )(x_pad, x_pad, x_pad, w_taps)

    # BN is identity in this module; no ReLU is applied in forward().
    out = out.reshape(N, H, W, Cout_p)[..., :Cout]
    return jnp.transpose(out, (0, 3, 1, 2)).astype(x_nchw.dtype)


if __name__ == "__main__":
    # Small shapes consistent with the module: batch=2, in_chan=4, out_chan=8, 16x16.
    N, Cin, Cout, H, W, KS = 2, 4, 8, 16, 16, 3

    key = jax.random.PRNGKey(0)
    kx, kw = jax.random.split(key)
    x = jax.random.normal(kx, (N, Cin, H, W), dtype=jnp.float32)
    w = jax.random.normal(kw, (Cout, Cin, KS, KS), dtype=jnp.float32) * 0.1

    # block_rows=8 exercises row tiling + the interior/boundary halo split (grid (2,2)).
    fn = jax.jit(functools.partial(conv_bn_relu_pallas, block_rows=8))
    out = jax.block_until_ready(fn(x, w))

    # Sanity-check against the XLA reference convolution (f32).
    ref = jax.lax.conv_general_dilated(
        x, w,
        window_strides=(1, 1),
        padding=((1, 1), (1, 1)),
        dimension_numbers=("NCHW", "OIHW", "NCHW"),
    )
    assert out.shape == (N, Cout, H, W)
    # bf16 inputs/outputs with f32 accumulation vs the f32 reference => loose tolerance.
    assert jnp.allclose(out, ref, atol=5e-2, rtol=5e-2), \
        float(jnp.max(jnp.abs(out - ref)))

    print("KERNEL_OK")
</pallas_src>

<mosaic_0001>
module attributes {stable_mosaic.version = 11 : i64} {
  func.func @conv_kernel(%arg0: i32, %arg1: i32, %arg2: memref<1x8x18x4xbf16, #tpu.memory_space<vmem>>, %arg3: memref<1x1x18x4xbf16, #tpu.memory_space<vmem>>, %arg4: memref<1x1x18x4xbf16, #tpu.memory_space<vmem>>, %arg5: memref<9x4x128xbf16, #tpu.memory_space<vmem>>, %arg6: memref<1x128x128xbf16, #tpu.memory_space<vmem>>, %arg7: memref<4x18x4xbf16, #tpu.memory_space<vmem>>) attributes {dimension_semantics = [#tpu.dimension_semantics<parallel>, #tpu.dimension_semantics<parallel>], iteration_bounds = array<i64: 2, 2>, scalar_prefetch = 0 : i64, scratch_operands = 1 : i64, tpu.core_type = #tpu.core_type<tc>, window_params = [{transform_indices = @transform_0, window_bounds = array<i64: 1, 8, 18, 4>}, {transform_indices = @transform_1, window_bounds = array<i64: 1, 1, 18, 4>}, {transform_indices = @transform_2, window_bounds = array<i64: 1, 1, 18, 4>}, {pipeline_mode = #tpu.pipeline_mode<synchronous>, transform_indices = @transform_3, window_bounds = array<i64: 9, 4, 128>}, {transform_indices = @transform_4, window_bounds = array<i64: 1, 128, 128>}]} {
    %c0 = arith.constant 0 : index
    %c0_0 = arith.constant 0 : index
    %c0_1 = arith.constant 0 : index
    %c0_2 = arith.constant 0 : index
    %0 = vector.load %arg2[%c0, %c0_0, %c0_1, %c0_2] : memref<1x8x18x4xbf16, #tpu.memory_space<vmem>>, vector<1x8x18x4xbf16>
    %1 = vector.shape_cast %0 : vector<1x8x18x4xbf16> to vector<8x18x4xbf16>
    %2 = vector.extract_strided_slice %1 {offsets = [0, 0, 0], sizes = [8, 16, 4], strides = [1, 1, 1]} : vector<8x18x4xbf16> to vector<8x16x4xbf16>
    %3 = vector.shape_cast %2 : vector<8x16x4xbf16> to vector<128x4xbf16>
    %4 = vector.extract_strided_slice %1 {offsets = [0, 1, 0], sizes = [8, 16, 4], strides = [1, 1, 1]} : vector<8x18x4xbf16> to vector<8x16x4xbf16>
    %5 = vector.shape_cast %4 : vector<8x16x4xbf16> to vector<128x4xbf16>
    %6 = vector.extract_strided_slice %1 {offsets = [0, 2, 0], sizes = [8, 16, 4], strides = [1, 1, 1]} : vector<8x18x4xbf16> to vector<8x16x4xbf16>
    %7 = vector.shape_cast %6 : vector<8x16x4xbf16> to vector<128x4xbf16>
    %8 = vector.extract_strided_slice %3 {offsets = [0, 0], sizes = [96, 4], strides = [1, 1]} : vector<128x4xbf16> to vector<96x4xbf16>
    %c0_3 = arith.constant 0 : index
    %c0_4 = arith.constant 0 : index
    %c0_5 = arith.constant 0 : index
    %9 = vector.load %arg5[%c0_3, %c0_4, %c0_5] : memref<9x4x128xbf16, #tpu.memory_space<vmem>>, vector<1x4x128xbf16>
    %10 = vector.shape_cast %9 : vector<1x4x128xbf16> to vector<4x128xbf16>
    %cst = arith.constant dense<0.000000e+00> : vector<96x128xf32>
    %11 = tpu.matmul %8, %10, %cst {dimension_numbers = #tpu.dot_dimension_numbers<[1], [0], [0], [1], [0, 0, 1, 1], [], []>} : vector<96x4xbf16>, vector<4x128xbf16>, vector<96x128xf32> -> vector<96x128xf32>
    %12 = vector.extract_strided_slice %5 {offsets = [0, 0], sizes = [96, 4], strides = [1, 1]} : vector<128x4xbf16> to vector<96x4xbf16>
    %c1 = arith.constant 1 : index
    %c0_6 = arith.constant 0 : index
    %c0_7 = arith.constant 0 : index
    %13 = vector.load %arg5[%c1, %c0_6, %c0_7] : memref<9x4x128xbf16, #tpu.memory_space<vmem>>, vector<1x4x128xbf16>
    %14 = vector.shape_cast %13 : vector<1x4x128xbf16> to vector<4x128xbf16>
    %cst_8 = arith.constant dense<0.000000e+00> : vector<96x128xf32>
    %15 = tpu.matmul %12, %14, %cst_8 {dimension_numbers = #tpu.dot_dimension_numbers<[1], [0], [0], [1], [0, 0, 1, 1], [], []>} : vector<96x4xbf16>, vector<4x128xbf16>, vector<96x128xf32> -> vector<96x128xf32>
    %16 = arith.addf %11, %15 : vector<96x128xf32>
    %17 = vector.extract_strided_slice %7 {offsets = [0, 0], sizes = [96, 4], strides = [1, 1]} : vector<128x4xbf16> to vector<96x4xbf16>
    %c2 = arith.constant 2 : index
    %c0_9 = arith.constant 0 : index
    %c0_10 = arith.constant 0 : index
    %18 = vector.load %arg5[%c2, %c0_9, %c0_10] : memref<9x4x128xbf16, #tpu.memory_space<vmem>>, vector<1x4x128xbf16>
    %19 = vector.shape_cast %18 : vector<1x4x128xbf16> to vector<4x128xbf16>
    %cst_11 = arith.constant dense<0.000000e+00> : vector<96x128xf32>
    %20 = tpu.matmul %17, %19, %cst_11 {dimension_numbers = #tpu.dot_dimension_numbers<[1], [0], [0], [1], [0, 0, 1, 1], [], []>} : vector<96x4xbf16>, vector<4x128xbf16>, vector<96x128xf32> -> vector<96x128xf32>
    %21 = arith.addf %16, %20 : vector<96x128xf32>
    %22 = vector.extract_strided_slice %3 {offsets = [16, 0], sizes = [96, 4], strides = [1, 1]} : vector<128x4xbf16> to vector<96x4xbf16>
    %c3 = arith.constant 3 : index
    %c0_12 = arith.constant 0 : index
    %c0_13 = arith.constant 0 : index
    %23 = vector.load %arg5[%c3, %c0_12, %c0_13] : memref<9x4x128xbf16, #tpu.memory_space<vmem>>, vector<1x4x128xbf16>
    %24 = vector.shape_cast %23 : vector<1x4x128xbf16> to vector<4x128xbf16>
    %cst_14 = arith.constant dense<0.000000e+00> : vector<96x128xf32>
    %25 = tpu.matmul %22, %24, %cst_14 {dimension_numbers = #tpu.dot_dimension_numbers<[1], [0], [0], [1], [0, 0, 1, 1], [], []>} : vector<96x4xbf16>, vector<4x128xbf16>, vector<96x128xf32> -> vector<96x128xf32>
    %26 = arith.addf %21, %25 : vector<96x128xf32>
    %27 = vector.extract_strided_slice %5 {offsets = [16, 0], sizes = [96, 4], strides = [1, 1]} : vector<128x4xbf16> to vector<96x4xbf16>
    %c4 = arith.constant 4 : index
    %c0_15 = arith.constant 0 : index
    %c0_16 = arith.constant 0 : index
    %28 = vector.load %arg5[%c4, %c0_15, %c0_16] : memref<9x4x128xbf16, #tpu.memory_space<vmem>>, vector<1x4x128xbf16>
    %29 = vector.shape_cast %28 : vector<1x4x128xbf16> to vector<4x128xbf16>
    %cst_17 = arith.constant dense<0.000000e+00> : vector<96x128xf32>
    %30 = tpu.matmul %27, %29, %cst_17 {dimension_numbers = #tpu.dot_dimension_numbers<[1], [0], [0], [1], [0, 0, 1, 1], [], []>} : vector<96x4xbf16>, vector<4x128xbf16>, vector<96x128xf32> -> vector<96x128xf32>
    %31 = arith.addf %26, %30 : vector<96x128xf32>
    %32 = vector.extract_strided_slice %7 {offsets = [16, 0], sizes = [96, 4], strides = [1, 1]} : vector<128x4xbf16> to vector<96x4xbf16>
    %c5 = arith.constant 5 : index
    %c0_18 = arith.constant 0 : index
    %c0_19 = arith.constant 0 : index
    %33 = vector.load %arg5[%c5, %c0_18, %c0_19] : memref<9x4x128xbf16, #tpu.memory_space<vmem>>, vector<1x4x128xbf16>
    %34 = vector.shape_cast %33 : vector<1x4x128xbf16> to vector<4x128xbf16>
    %cst_20 = arith.constant dense<0.000000e+00> : vector<96x128xf32>
    %35 = tpu.matmul %32, %34, %cst_20 {dimension_numbers = #tpu.dot_dimension_numbers<[1], [0], [0], [1], [0, 0, 1, 1], [], []>} : vector<96x4xbf16>, vector<4x128xbf16>, vector<96x128xf32> -> vector<96x128xf32>
    %36 = arith.addf %31, %35 : vector<96x128xf32>
    %37 = vector.extract_strided_slice %3 {offsets = [32, 0], sizes = [96, 4], strides = [1, 1]} : vector<128x4xbf16> to vector<96x4xbf16>
    %c6 = arith.constant 6 : index
    %c0_21 = arith.constant 0 : index
    %c0_22 = arith.constant 0 : index
    %38 = vector.load %arg5[%c6, %c0_21, %c0_22] : memref<9x4x128xbf16, #tpu.memory_space<vmem>>, vector<1x4x128xbf16>
    %39 = vector.shape_cast %38 : vector<1x4x128xbf16> to vector<4x128xbf16>
    %cst_23 = arith.constant dense<0.000000e+00> : vector<96x128xf32>
    %40 = tpu.matmul %37, %39, %cst_23 {dimension_numbers = #tpu.dot_dimension_numbers<[1], [0], [0], [1], [0, 0, 1, 1], [], []>} : vector<96x4xbf16>, vector<4x128xbf16>, vector<96x128xf32> -> vector<96x128xf32>
    %41 = arith.addf %36, %40 : vector<96x128xf32>
    %42 = vector.extract_strided_slice %5 {offsets = [32, 0], sizes = [96, 4], strides = [1, 1]} : vector<128x4xbf16> to vector<96x4xbf16>
    %c7 = arith.constant 7 : index
    %c0_24 = arith.constant 0 : index
    %c0_25 = arith.constant 0 : index
    %43 = vector.load %arg5[%c7, %c0_24, %c0_25] : memref<9x4x128xbf16, #tpu.memory_space<vmem>>, vector<1x4x128xbf16>
    %44 = vector.shape_cast %43 : vector<1x4x128xbf16> to vector<4x128xbf16>
    %cst_26 = arith.constant dense<0.000000e+00> : vector<96x128xf32>
    %45 = tpu.matmul %42, %44, %cst_26 {dimension_numbers = #tpu.dot_dimension_numbers<[1], [0], [0], [1], [0, 0, 1, 1], [], []>} : vector<96x4xbf16>, vector<4x128xbf16>, vector<96x128xf32> -> vector<96x128xf32>
    %46 = arith.addf %41, %45 : vector<96x128xf32>
    %47 = vector.extract_strided_slice %7 {offsets = [32, 0], sizes = [96, 4], strides = [1, 1]} : vector<128x4xbf16> to vector<96x4xbf16>
    %c8 = arith.constant 8 : index
    %c0_27 = arith.constant 0 : index
    %c0_28 = arith.constant 0 : index
    %48 = vector.load %arg5[%c8, %c0_27, %c0_28] : memref<9x4x128xbf16, #tpu.memory_space<vmem>>, vector<1x4x128xbf16>
    %49 = vector.shape_cast %48 : vector<1x4x128xbf16> to vector<4x128xbf16>
    %cst_29 = arith.constant dense<0.000000e+00> : vector<96x128xf32>
    %50 = tpu.matmul %47, %49, %cst_29 {dimension_numbers = #tpu.dot_dimension_numbers<[1], [0], [0], [1], [0, 0, 1, 1], [], []>} : vector<96x4xbf16>, vector<4x128xbf16>, vector<96x128xf32> -> vector<96x128xf32>
    %51 = arith.addf %46, %50 : vector<96x128xf32>
    %52 = arith.truncf %51 : vector<96x128xf32> to vector<96x128xbf16>
    %c0_30 = arith.constant 0 : index
    %c0_31 = arith.constant 0 : index
    %c0_32 = arith.constant 0 : index
    %53 = vector.load %arg6[%c0_30, %c0_31, %c0_32] : memref<1x128x128xbf16, #tpu.memory_space<vmem>>, vector<1x96x128xbf16>
    %54 = vector.shape_cast %53 : vector<1x96x128xbf16> to vector<96x128xbf16>
    %55 = vector.shape_cast %52 : vector<96x128xbf16> to vector<1x96x128xbf16>
    tpu.vector_store %arg6[%c0_30, %c0_31, %c0_32], %55 {strides = array<i32>} : memref<1x128x128xbf16, #tpu.memory_space<vmem>>, vector<1x96x128xbf16>,
    %56 = vector.extract_strided_slice %1 {offsets = [6, 0, 0], sizes = [2, 18, 4], strides = [1, 1, 1]} : vector<8x18x4xbf16> to vector<2x18x4xbf16>
    %c0_33 = arith.constant 0 : index
    %c0_34 = arith.constant 0 : index
    %c0_35 = arith.constant 0 : index
    %57 = vector.load %arg7[%c0_33, %c0_34, %c0_35] : memref<4x18x4xbf16, #tpu.memory_space<vmem>>, vector<2x18x4xbf16>
    tpu.vector_store %arg7[%c0_33, %c0_34, %c0_35], %56 {strides = array<i32>} : memref<4x18x4xbf16, #tpu.memory_space<vmem>>, vector<2x18x4xbf16>,
    %c0_36 = arith.constant 0 : index
    %c0_37 = arith.constant 0 : index
    %c0_38 = arith.constant 0 : index
    %c0_39 = arith.constant 0 : index
    %58 = vector.load %arg3[%c0_36, %c0_37, %c0_38, %c0_39] : memref<1x1x18x4xbf16, #tpu.memory_space<vmem>>, vector<1x1x18x4xbf16>
    %59 = vector.shape_cast %58 : vector<1x1x18x4xbf16> to vector<18x4xbf16>
    %c2_40 = arith.constant 2 : index
    %c0_41 = arith.constant 0 : index
    %c0_42 = arith.constant 0 : index
    %60 = vector.load %arg7[%c2_40, %c0_41, %c0_42] : memref<4x18x4xbf16, #tpu.memory_space<vmem>>, vector<1x18x4xbf16>
    %61 = vector.shape_cast %60 : vector<1x18x4xbf16> to vector<18x4xbf16>
    %62 = vector.shape_cast %59 : vector<18x4xbf16> to vector<1x18x4xbf16>
    tpu.vector_store %arg7[%c2_40, %c0_41, %c0_42], %62 {strides = array<i32>} : memref<4x18x4xbf16, #tpu.memory_space<vmem>>, vector<1x18x4xbf16>,
    %c0_43 = arith.constant 0 : index
    %c0_44 = arith.constant 0 : index
    %c0_45 = arith.constant 0 : index
    %c0_46 = arith.constant 0 : index
    %63 = vector.load %arg4[%c0_43, %c0_44, %c0_45, %c0_46] : memref<1x1x18x4xbf16, #tpu.memory_space<vmem>>, vector<1x1x18x4xbf16>
    %64 = vector.shape_cast %63 : vector<1x1x18x4xbf16> to vector<18x4xbf16>
    %c3_47 = arith.constant 3 : index
    %c0_48 = arith.constant 0 : index
    %c0_49 = arith.constant 0 : index
    %65 = vector.load %arg7[%c3_47, %c0_48, %c0_49] : memref<4x18x4xbf16, #tpu.memory_space<vmem>>, vector<1x18x4xbf16>
    %66 = vector.shape_cast %65 : vector<1x18x4xbf16> to vector<18x4xbf16>
    %67 = vector.shape_cast %64 : vector<18x4xbf16> to vector<1x18x4xbf16>
    tpu.vector_store %arg7[%c3_47, %c0_48, %c0_49], %67 {strides = array<i32>} : memref<4x18x4xbf16, #tpu.memory_space<vmem>>, vector<1x18x4xbf16>,
    %c0_50 = arith.constant 0 : index
    %c0_51 = arith.constant 0 : index
    %c0_52 = arith.constant 0 : index
    %68 = vector.load %arg7[%c0_50, %c0_51, %c0_52] : memref<4x18x4xbf16, #tpu.memory_space<vmem>>, vector<4x18x4xbf16>
    %69 = vector.extract_strided_slice %68 {offsets = [0, 0, 0], sizes = [4, 16, 4], strides = [1, 1, 1]} : vector<4x18x4xbf16> to vector<4x16x4xbf16>
    %70 = vector.shape_cast %69 : vector<4x16x4xbf16> to vector<64x4xbf16>
    %71 = vector.extract_strided_slice %68 {offsets = [0, 1, 0], sizes = [4, 16, 4], strides = [1, 1, 1]} : vector<4x18x4xbf16> to vector<4x16x4xbf16>
    %72 = vector.shape_cast %71 : vector<4x16x4xbf16> to vector<64x4xbf16>
    %73 = vector.extract_strided_slice %68 {offsets = [0, 2, 0], sizes = [4, 16, 4], strides = [1, 1, 1]} : vector<4x18x4xbf16> to vector<4x16x4xbf16>
    %74 = vector.shape_cast %73 : vector<4x16x4xbf16> to vector<64x4xbf16>
    %75 = vector.extract_strided_slice %70 {offsets = [0, 0], sizes = [32, 4], strides = [1, 1]} : vector<64x4xbf16> to vector<32x4xbf16>
    %c0_53 = arith.constant 0 : index
    %c0_54 = arith.constant 0 : index
    %c0_55 = arith.constant 0 : index
    %76 = vector.load %arg5[%c0_53, %c0_54, %c0_55] : memref<9x4x128xbf16, #tpu.memory_space<vmem>>, vector<1x4x128xbf16>
    %77 = vector.shape_cast %76 : vector<1x4x128xbf16> to vector<4x128xbf16>
    %cst_56 = arith.constant dense<0.000000e+00> : vector<32x128xf32>
    %78 = tpu.matmul %75, %77, %cst_56 {dimension_numbers = #tpu.dot_dimension_numbers<[1], [0], [0], [1], [0, 0, 1, 1], [], []>} : vector<32x4xbf16>, vector<4x128xbf16>, vector<32x128xf32> -> vector<32x128xf32>
    %79 = vector.extract_strided_slice %72 {offsets = [0, 0], sizes = [32, 4], strides = [1, 1]} : vector<64x4xbf16> to vector<32x4xbf16>
    %c1_57 = arith.constant 1 : index
    %c0_58 = arith.constant 0 : index
    %c0_59 = arith.constant 0 : index
    %80 = vector.load %arg5[%c1_57, %c0_58, %c0_59] : memref<9x4x128xbf16, #tpu.memory_space<vmem>>, vector<1x4x128xbf16>
    %81 = vector.shape_cast %80 : vector<1x4x128xbf16> to vector<4x128xbf16>
    %cst_60 = arith.constant dense<0.000000e+00> : vector<32x128xf32>
    %82 = tpu.matmul %79, %81, %cst_60 {dimension_numbers = #tpu.dot_dimension_numbers<[1], [0], [0], [1], [0, 0, 1, 1], [], []>} : vector<32x4xbf16>, vector<4x128xbf16>, vector<32x128xf32> -> vector<32x128xf32>
    %83 = arith.addf %78, %82 : vector<32x128xf32>
    %84 = vector.extract_strided_slice %74 {offsets = [0, 0], sizes = [32, 4], strides = [1, 1]} : vector<64x4xbf16> to vector<32x4xbf16>
    %c2_61 = arith.constant 2 : index
    %c0_62 = arith.constant 0 : index
    %c0_63 = arith.constant 0 : index
    %85 = vector.load %arg5[%c2_61, %c0_62, %c0_63] : memref<9x4x128xbf16, #tpu.memory_space<vmem>>, vector<1x4x128xbf16>
    %86 = vector.shape_cast %85 : vector<1x4x128xbf16> to vector<4x128xbf16>
    %cst_64 = arith.constant dense<0.000000e+00> : vector<32x128xf32>
    %87 = tpu.matmul %84, %86, %cst_64 {dimension_numbers = #tpu.dot_dimension_numbers<[1], [0], [0], [1], [0, 0, 1, 1], [], []>} : vector<32x4xbf16>, vector<4x128xbf16>, vector<32x128xf32> -> vector<32x128xf32>
    %88 = arith.addf %83, %87 : vector<32x128xf32>
    %89 = vector.extract_strided_slice %70 {offsets = [16, 0], sizes = [32, 4], strides = [1, 1]} : vector<64x4xbf16> to vector<32x4xbf16>
    %c3_65 = arith.constant 3 : index
    %c0_66 = arith.constant 0 : index
    %c0_67 = arith.constant 0 : index
    %90 = vector.load %arg5[%c3_65, %c0_66, %c0_67] : memref<9x4x128xbf16, #tpu.memory_space<vmem>>, vector<1x4x128xbf16>
    %91 = vector.shape_cast %90 : vector<1x4x128xbf16> to vector<4x128xbf16>
    %cst_68 = arith.constant dense<0.000000e+00> : vector<32x128xf32>
    %92 = tpu.matmul %89, %91, %cst_68 {dimension_numbers = #tpu.dot_dimension_numbers<[1], [0], [0], [1], [0, 0, 1, 1], [], []>} : vector<32x4xbf16>, vector<4x128xbf16>, vector<32x128xf32> -> vector<32x128xf32>
    %93 = arith.addf %88, %92 : vector<32x128xf32>
    %94 = vector.extract_strided_slice %72 {offsets = [16, 0], sizes = [32, 4], strides = [1, 1]} : vector<64x4xbf16> to vector<32x4xbf16>
    %c4_69 = arith.constant 4 : index
    %c0_70 = arith.constant 0 : index
    %c0_71 = arith.constant 0 : index
    %95 = vector.load %arg5[%c4_69, %c0_70, %c0_71] : memref<9x4x128xbf16, #tpu.memory_space<vmem>>, vector<1x4x128xbf16>
    %96 = vector.shape_cast %95 : vector<1x4x128xbf16> to vector<4x128xbf16>
    %cst_72 = arith.constant dense<0.000000e+00> : vector<32x128xf32>
    %97 = tpu.matmul %94, %96, %cst_72 {dimension_numbers = #tpu.dot_dimension_numbers<[1], [0], [0], [1], [0, 0, 1, 1], [], []>} : vector<32x4xbf16>, vector<4x128xbf16>, vector<32x128xf32> -> vector<32x128xf32>
    %98 = arith.addf %93, %97 : vector<32x128xf32>
    %99 = vector.extract_strided_slice %74 {offsets = [16, 0], sizes = [32, 4], strides = [1, 1]} : vector<64x4xbf16> to vector<32x4xbf16>
    %c5_73 = arith.constant 5 : index
    %c0_74 = arith.constant 0 : index
    %c0_75 = arith.constant 0 : index
    %100 = vector.load %arg5[%c5_73, %c0_74, %c0_75] : memref<9x4x128xbf16, #tpu.memory_space<vmem>>, vector<1x4x128xbf16>
    %101 = vector.shape_cast %100 : vector<1x4x128xbf16> to vector<4x128xbf16>
    %cst_76 = arith.constant dense<0.000000e+00> : vector<32x128xf32>
    %102 = tpu.matmul %99, %101, %cst_76 {dimension_numbers = #tpu.dot_dimension_numbers<[1], [0], [0], [1], [0, 0, 1, 1], [], []>} : vector<32x4xbf16>, vector<4x128xbf16>, vector<32x128xf32> -> vector<32x128xf32>
    %103 = arith.addf %98, %102 : vector<32x128xf32>
    %104 = vector.extract_strided_slice %70 {offsets = [32, 0], sizes = [32, 4], strides = [1, 1]} : vector<64x4xbf16> to vector<32x4xbf16>
    %c6_77 = arith.constant 6 : index
    %c0_78 = arith.constant 0 : index
    %c0_79 = arith.constant 0 : index
    %105 = vector.load %arg5[%c6_77, %c0_78, %c0_79] : memref<9x4x128xbf16, #tpu.memory_space<vmem>>, vector<1x4x128xbf16>
    %106 = vector.shape_cast %105 : vector<1x4x128xbf16> to vector<4x128xbf16>
    %cst_80 = arith.constant dense<0.000000e+00> : vector<32x128xf32>
    %107 = tpu.matmul %104, %106, %cst_80 {dimension_numbers = #tpu.dot_dimension_numbers<[1], [0], [0], [1], [0, 0, 1, 1], [], []>} : vector<32x4xbf16>, vector<4x128xbf16>, vector<32x128xf32> -> vector<32x128xf32>
    %108 = arith.addf %103, %107 : vector<32x128xf32>
    %109 = vector.extract_strided_slice %72 {offsets = [32, 0], sizes = [32, 4], strides = [1, 1]} : vector<64x4xbf16> to vector<32x4xbf16>
    %c7_81 = arith.constant 7 : index
    %c0_82 = arith.constant 0 : index
    %c0_83 = arith.constant 0 : index
    %110 = vector.load %arg5[%c7_81, %c0_82, %c0_83] : memref<9x4x128xbf16, #tpu.memory_space<vmem>>, vector<1x4x128xbf16>
    %111 = vector.shape_cast %110 : vector<1x4x128xbf16> to vector<4x128xbf16>
    %cst_84 = arith.constant dense<0.000000e+00> : vector<32x128xf32>
    %112 = tpu.matmul %109, %111, %cst_84 {dimension_numbers = #tpu.dot_dimension_numbers<[1], [0], [0], [1], [0, 0, 1, 1], [], []>} : vector<32x4xbf16>, vector<4x128xbf16>, vector<32x128xf32> -> vector<32x128xf32>
    %113 = arith.addf %108, %112 : vector<32x128xf32>
    %114 = vector.extract_strided_slice %74 {offsets = [32, 0], sizes = [32, 4], strides = [1, 1]} : vector<64x4xbf16> to vector<32x4xbf16>
    %c8_85 = arith.constant 8 : index
    %c0_86 = arith.constant 0 : index
    %c0_87 = arith.constant 0 : index
    %115 = vector.load %arg5[%c8_85, %c0_86, %c0_87] : memref<9x4x128xbf16, #tpu.memory_space<vmem>>, vector<1x4x128xbf16>
    %116 = vector.shape_cast %115 : vector<1x4x128xbf16> to vector<4x128xbf16>
    %cst_88 = arith.constant dense<0.000000e+00> : vector<32x128xf32>
    %117 = tpu.matmul %114, %116, %cst_88 {dimension_numbers = #tpu.dot_dimension_numbers<[1], [0], [0], [1], [0, 0, 1, 1], [], []>} : vector<32x4xbf16>, vector<4x128xbf16>, vector<32x128xf32> -> vector<32x128xf32>
    %118 = arith.addf %113, %117 : vector<32x128xf32>
    %119 = arith.truncf %118 : vector<32x128xf32> to vector<32x128xbf16>
    %c0_89 = arith.constant 0 : index
    %c96 = arith.constant 96 : index
    %c0_90 = arith.constant 0 : index
    %120 = vector.load %arg6[%c0_89, %c96, %c0_90] : memref<1x128x128xbf16, #tpu.memory_space<vmem>>, vector<1x32x128xbf16>
    %121 = vector.shape_cast %120 : vector<1x32x128xbf16> to vector<32x128xbf16>
    %122 = vector.shape_cast %119 : vector<32x128xbf16> to vector<1x32x128xbf16>
    tpu.vector_store %arg6[%c0_89, %c96, %c0_90], %122 {strides = array<i32>} : memref<1x128x128xbf16, #tpu.memory_space<vmem>>, vector<1x32x128xbf16>,
    return
  }
  func.func @transform_0(%arg0: i32, %arg1: i32) -> (i32, i32, i32, i32) {
    %c0_i32 = arith.constant 0 : i32
    %c0_i32_0 = arith.constant 0 : i32
    %c0_i32_1 = arith.constant 0 : i32
    return %arg0, %arg1, %c0_i32, %c0_i32_0 : i32, i32, i32, i32
  }
  func.func @transform_1(%arg0: i32, %arg1: i32) -> (i32, i32, i32, i32) {
    %c1_i32 = arith.constant 1 : i32
    %0 = arith.addi %arg1, %c1_i32 : i32
    %c8_i32 = arith.constant 8 : i32
    %1 = arith.muli %0, %c8_i32 : i32
    %c0_i32 = arith.constant 0 : i32
    %c0_i32_0 = arith.constant 0 : i32
    %c0_i32_1 = arith.constant 0 : i32
    return %arg0, %1, %c0_i32, %c0_i32_0 : i32, i32, i32, i32
  }
  func.func @transform_2(%arg0: i32, %arg1: i32) -> (i32, i32, i32, i32) {
    %c1_i32 = arith.constant 1 : i32
    %0 = arith.addi %arg1, %c1_i32 : i32
    %c8_i32 = arith.constant 8 : i32
    %1 = arith.muli %0, %c8_i32 : i32
    %c1_i32_0 = arith.constant 1 : i32
    %2 = arith.addi %1, %c1_i32_0 : i32
    %c0_i32 = arith.constant 0 : i32
    %c0_i32_1 = arith.constant 0 : i32
    %c0_i32_2 = arith.constant 0 : i32
    return %arg0, %2, %c0_i32, %c0_i32_1 : i32, i32, i32, i32
  }
  func.func @transform_3(%arg0: i32, %arg1: i32) -> (i32, i32, i32) {
    %c0_i32 = arith.constant 0 : i32
    %c0_i32_0 = arith.constant 0 : i32
    %c0_i32_1 = arith.constant 0 : i32
    %c0_i32_2 = arith.constant 0 : i32
    return %c0_i32, %c0_i32_0, %c0_i32_1 : i32, i32, i32
  }
  func.func @transform_4(%arg0: i32, %arg1: i32) -> (i32, i32, i32) {
    %c0_i32 = arith.constant 0 : i32
    %c0_i32_0 = arith.constant 0 : i32
    return %arg0, %arg1, %c0_i32 : i32, i32, i32
  }
}

</mosaic_0001>

<bundles_post_ra>
// kernel: conv_bn_relu_pallas.1
= control target key start
LH: loop header
LB: loop body
LE: loop exit
PB: predicated region body
PF: predicated region fallthrough
CT: control target
= control target key end

     0   :  { %s3291_s15 = smov 0   ;;  %s3293_s16 = smov 0   ;;  %s4247_s0 = inlined_call_operand.vmem [shape: bf16[2,18,18,4], index: 0, kind: input, shape index: {}, may-alias: {0,1,2}]   ;;  %s4248_s1 = inlined_call_operand.vmem [shape: bf16[2,18,18,4], index: 1, kind: input, shape index: {}, may-alias: {0,1,2}]   ;;  %s4249_s2 = inlined_call_operand.vmem [shape: bf16[2,18,18,4], index: 2, kind: input, shape index: {}, may-alias: {0,1,2}]   ;;  %s4250_s3 = inlined_call_operand.vmem [shape: bf16[9,4,128], index: 3, kind: input, shape index: {}]   ;;  %s4251_s4 = inlined_call_operand.vmem [shape: bf16[2,256,128], index: 4, kind: output, shape index: {}]  }
   0x1   :  { %s3295_s17 = smov 0   ;;  %s3297_s18 = smov 0  }
   0x2   :  { %s3299_s19 = smov 0  }
   0x3 LB: > { %s23_s20 = sadd.s32 1, %s3256_s17  ;;  %s26_s21 = sadd.s32 1, %s3260_s18  ;;  %s3264_s19 = sphi %s3299_s19, %s14_s19   ;;  %s3260_s18 = sphi %s3297_s18, %s4296_s18   ;;  %s3256_s17 = sphi %s3295_s17, %s4295_s17   ;;  %s3252_s16 = sphi %s3293_s16, %s4294_s16   ;;  %s3248_s15 = sphi %s3291_s15, %s4293_s15  }
   0x4   : > { %p24_p0 = scmp.ge.s32.totalorder %s23_s20, 2  ;;  %p2644_p1 = scmp.ge.s32.totalorder %s3264_s19, 1 }
   0x5   : > { %p246_p2 = scmp.lt.s32.totalorder %s3264_s19, 5 }
   0x6   : > { %s4298_s20 = smov (%p24_p0, %s23_s20), 0  ;;  %s4300_s21 = smov (!%p24_p0, %s26_s21), %s3260_s18 }
   0x7   : > { %p247_p3 = pnand %p2644_p1, %p246_p2  ;;  %p28_p4 = scmp.ge.s32.totalorder %s4300_s21, 2 }
   0x9   : > { %s4302_s21 = smov (%p28_p4, %s4300_s21), 0  ;;  %250 = sbr.rel (%p247_p3) target bundleno = 390 (0x186), region = 36 }
   0xe   : > { %v671_v0 = vld [vmem:[%s4250_s3] sm:$0x3]  ;;  %vm711_vm0 = vcmask 1041408   ;;  %s2645_s24 = sshll.u32 %s3248_s15, 3  ;;  %p315_p5 = scmp.lt.s32.totalorder %s3252_s16, 1  ;;  %vm692_vm1 = vcmask 31744  }
   0xf   : > { %3154 = vmatprep.subr.msk.bf16.mxu1 %vm711_vm0, %v671_v0  ;;  %v833_v1 = vsel %vm711_vm0, %v671_v0, 0  ;;  %p317_p6 = scmp.lt.s32.totalorder %s2645_s24, 17  ;;  %v2662_v2 = vld [vmem:[%s4250_s3 + $0x2] sm:$0x3]  ;;  %v2687_v4 = vld [vmem:[%s4250_s3 + $0x4] sm:$0x3] }
  0x10   : > { %2988 = vmatpush3.bf16.msra.mxu1 %v833_v1  ;;  %s4304_s16 = smov (!%p315_p5, %s3252_s16), 1  ;;  %3153 = vmatprep.subr.msk.bf16.mxu0 %vm711_vm0, %v2662_v2  ;;  %v713_v3 = vsel %vm711_vm0, %v2662_v2, 0  ;;  %v2700_v5 = vld [vmem:[%s4250_s3 + $0x6] sm:$0x3]  ;;  %s2817_s8 = sadd.s32 8, %s2645_s24  ;;  %v3378_v15 = vsel %vm711_vm0, %v2687_v4, 0 }
  0x11   : > { %s318_s29 = scalar_select %p317_p6, %s2645_s24, 17  ;;  %2974 = vmatpush3.bf16.msra.mxu0 %v713_v3  ;;  %3156 = vmatprep.subr.msk.bf16.mxu1 %vm711_vm0, %v2700_v5  ;;  %vm393_vm2 = vsmask.f32 3328  ;;  %vm394_vm3 = vsmask.f32 7440  ;;  %v1059_v18 = vsel %vm711_vm0, %v2700_v5, 0 }
  0x12   : > { %s3343_s6 = smul.u32 54, %s4304_s16  ;;  %3155 = vmatprep.subr.msk.bf16.mxu0 %vm711_vm0, %v2687_v4  ;;  %p334_p7 = scmp.lt.s32.totalorder %s2817_s8, 17  ;;  %v3394_v19 = vld [vmem:[%s4250_s3 + $0xa] sm:$0x3]  ;;  %vm1734_vm4 = vcmask 27648   ;;  %vm1737_vm5 = vcmask 24576   ;;  %vm3438_vm6 = vmor %vm393_vm2, %vm394_vm3 }
  0x13   : > { %s3171_s7 = smul.u32 3, %s318_s29  ;;  %s345_s11 = sadd.s32 1, %s2817_s8  ;;  %vm612_vm7 = vcmask 1042432   ;;  %vm613_vm8 = vcmask 1046532  }
  0x14   : > { %p3353_p8 = scmp.lt.s32.totalorder %s345_s11, 17  ;;  %s4306_s8 = smov (!%p334_p7, %s2817_s8), 17  ;;  %vm3626_vm9 = vmor %vm612_vm7, %vm613_vm8 }
  0x15   : > { %s321_s9 = sadd.s32 %s3343_s6, %s3171_s7  ;;  %s3173_s25 = smul.u32 3, %s4306_s8 }
  0x16   : > { %s2646_s10 = sshll.u32 %s321_s9, 2  ;;  %s4308_s11 = smov (!%p3353_p8, %s345_s11), 17 }
  0x17   : > { %s3351_s14 = scalar_lea.vmem %s4247_s0, %s2646_s10  ;;  %s3174_s26 = smul.u32 3, %s4308_s11 }
  0x18   : > { %v3358_v6 = vld [vmem:[%s3351_s14] sm:$0xf]  ;;  %v3361_v7 = vld [vmem:[%s3351_s14 + $0x4] sm:$0xf]  ;;  %v3364_v8 = vld [vmem:[%s3351_s14 + $0xc] sm:$0xf]  ;;  %s3451_s27 = sadd.s32 %s3173_s25, %s3343_s6 }
  0x19   : > { %v397_v9 = vshrl.u32 %v3358_v6, 16  ;;  %v400_v10 = vshll.u32 %v3358_v6, 16  ;;  %v3369_v11 = vld [vmem:[%s3351_s14 + $0x10] sm:$0xf]  ;;  %v410_v12 = vshrl.u32 %v3361_v7, 16  ;;  %v2675_v13 = vcombine.low %v3358_v6, %v3361_v7  ;;  %s3458_s28 = sadd.s32 %s3174_s26, %s3343_s6  ;;  %s2648_s29 = sshll.u32 %s3451_s27, 2 }
  0x1a   : > { %v3375_v14 = vld [vmem:[%s3351_s14 + $0x18] sm:$0xf]  ;;  %v3385_v16 = vcombine.low %v3364_v8, %v3369_v11  ;;  %v3388_v17 = vld [vmem:[%s3351_s14 + $0x1c] sm:$0xf]  ;;  %v617_v20 = vrot.slane %v3361_v7, 5  ;;  %v421_v21 = vshrl.u32 %v3364_v8, 16  ;;  %s3495_s7 = scalar_lea.vmem %s4248_s1, %s2648_s29 }
  0x1b   : > { %2989 = vmatprep.mubr.msk.bf16.mxu1 %vm692_vm1, %v2675_v13  ;;  %v424_v22 = vshll.u32 %v3364_v8, 16  ;;  %v434_v23 = vshrl.u32 %v3369_v11, 16  ;;  %v3406_v24 = vld [vmem:[%s3351_s14 + $0x8] sm:$0x1]  ;;  %v445_v25 = vshrl.u32 %v3375_v14, 16  ;;  %v3413_v26 = vcombine.low %v3375_v14, %v3388_v17  ;;  %s2650_s30 = sshll.u32 %s3458_s28, 2 }
  0x1c   : > { %2990 = vmatmul.mubr.msk.bf16.vlgmr.msra.gmra.mxu1 %vm692_vm1, %v3385_v16  ;;  %v399_v27 = vrot.slane %v397_v9, 4  ;;  %v402_v28 = vrot.slane %v400_v10, 5  ;;  %v3416_v29 = vld [vmem:[%s3351_s14 + $0x24] sm:$0xf]  ;;  %v448_v30 = vshll.u32 %v3375_v14, 16  ;;  %v406_v31 = vshll.u32 %v3361_v7, 16  ;;  %s3508_s10 = scalar_lea.vmem %s4249_s2, %s2650_s30 }
  0x1d   : > { %v412_v32 = vrot.slane %v410_v12, 4  ;;  %v416_v33 = vshll.u32 %v3406_v24, 16  ;;  %v3423_v34 = vld [vmem:[%s3351_s14 + $0x28] sm:$0xf]  ;;  %3016 = vmatpush3.bf16.msra.mxu1 %v1059_v18  ;;  %v458_v35 = vshrl.u32 %v3388_v17, 16  ;;  %2993 = vmatprep.mubr.msk.bf16.mxu1 %vm692_vm1, %v3413_v26  ;;  %v469_v37 = vshrl.u32 %v3416_v29, 16 }
  0x1e   : > { %v403_v36 = vor.u32 %v402_v28, %v399_v27  ;;  %v472_v38 = vshll.u32 %v3416_v29, 16  ;;  %v3431_v39 = vld [vmem:[%s3351_s14 + $0x14] sm:$0x1]  ;;  %3158 = vmatprep.subr.msk.bf16.mxu1 %vm711_vm0, %v3394_v19  ;;  %v408_v41 = vrot.slane %v406_v31, 5  ;;  %v482_v42 = vshrl.u32 %v3423_v34, 16  ;;  %s2651_s25 = sshll.u32 %s3248_s15, 4 }
  0x1f   : > { %v3445_v43 = vcombine.low %v3416_v29, %v3423_v34  ;;  %v423_v44 = vrot.slane %v421_v21, 4  ;;  %v3448_v45 = vld [vmem:[%s3351_s14 + $0x30] sm:$0xf]  ;;  %v426_v47 = vrot.slane %v424_v22, 5  ;;  %v430_v48 = vshll.u32 %v3369_v11, 16  ;;  %p361_p9 = scmp.lt.s32.totalorder %s2651_s25, 31 }
  0x20   : > { %v404_v46 = vrot.slane %v403_v36, 4  ;;  %v436_v49 = vrot.slane %v434_v23, 4  ;;  %v3455_v50 = vld [vmem:[%s3351_s14 + $0x34] sm:$0xf]  ;;  %v413_v51 = vor.u32 %v412_v32, %v408_v41  ;;  %v418_v52 = vrot.slane %v416_v33, 5  ;;  %s2652_s15 = sshll.u32 %s4304_s16, 5 }
  0x21   : > { %v440_v53 = vshll.u32 %v3431_v39, 16  ;;  %v493_v54 = vshrl.u32 %v3448_v45, 16  ;;  %v427_v56 = vor.u32 %v426_v47, %v423_v44  ;;  %v432_v57 = vrot.slane %v430_v48, 5  ;;  %v3466_v59 = vld [vmem:[%s3351_s14 + $0x20] sm:$0x1]  ;;  %s4310_s25 = smov (!%p361_p9, %s2651_s25), 31 }
  0x22   : > { %v409_v55 = vsel %vm3438_vm6, %v404_v46, %v408_v41  ;;  %v496_v58 = vshll.u32 %v3448_v45, 16  ;;  %v414_v60 = vrot.slane %v413_v51, 4  ;;  %v506_v62 = vshrl.u32 %v3455_v50, 16  ;;  %v3475_v0 = vld [vmem:[%s3351_s14 + $0x3c] sm:$0xf]  ;;  %s364_s16 = sadd.s32 %s2652_s15, %s4310_s25 }
  0x23   : > { %v442_v61 = vrot.slane %v440_v53, 5  ;;  %v3472_v63 = vcombine.low %v3448_v45, %v3455_v50  ;;  %v428_v1 = vrot.slane %v427_v56, 4  ;;  %v437_v2 = vor.u32 %v436_v49, %v432_v57  ;;  %v3481_v5 = vld [vmem:[%s3351_s14 + $0x40] sm:$0xf]  ;;  %v3490_v18 = vld [vmem:[%s3351_s14 + $0x2c] sm:$0x1] }
  0x24   : > { %2994 = vmatmul.mubr.msk.bf16.gmra.mxu1 %vm692_vm1, %v3445_v43  ;;  %v447_v3 = vrot.slane %v445_v25, 4  ;;  %v450_v4 = vrot.slane %v448_v30, 5  ;;  %v419_v9 = vsel %vm3438_vm6, %v414_v60, %v418_v52  ;;  %v454_v10 = vshll.u32 %v3388_v17, 16  ;;  %v3500_v27 = vld [vmem:[%s3351_s14 + $0x48] sm:$0xf]  ;;  %s2653_s26 = sshll.u32 %s364_s16, 2 }
  0x25   : > { %2997 = vmatprep.mubr.msk.bf16.mxu1 %vm692_vm1, %v3472_v63  ;;  %v460_v12 = vrot.slane %v458_v35, 4  ;;  %v464_v13 = vshll.u32 %v3466_v59, 16  ;;  %v2663_v21 = vcombine.low %v409_v55, %v419_v9  ;;  %v433_v22 = vsel %vm3438_vm6, %v428_v1, %v432_v57  ;;  %v3503_v28 = vld [vmem:[%s3351_s14 + $0x4c] sm:$0xf]  ;;  %1735 = vst.msk [vmem:[#allocation2] sm:$0xf] %vm1734_vm4, %v3500_v27  ;;  %s4178_s29 = scalar_lea.vmem %s4251_s4, %s2653_s26 }
  0x26   : > { %v438_v23 = vrot.slane %v437_v2, 4  ;;  %v451_v25 = vor.u32 %v450_v4, %v447_v3  ;;  %v456_v30 = vrot.slane %v454_v10, 5  ;;  %v517_v32 = vshrl.u32 %v3475_v0, 16  ;;  %1736 = vst.msk [vmem:[#allocation2 + $0x4] sm:$0xf] %vm1734_vm4, %v3503_v28 }
  0x27   : > { %v466_v31 = vrot.slane %v464_v13, 5  ;;  %v520_v33 = vshll.u32 %v3475_v0, 16  ;;  %v3517_v35 = vld [vmem:[%s3351_s14 + $0x50] sm:$0x1]  ;;  %2975 = vmatprep.mubr.msk.bf16.mxu0 %vm692_vm1, %v2663_v21  ;;  %v530_v44 = vshrl.u32 %v3481_v5, 16  ;;  %v3525_v46 = vcombine.low %v3475_v0, %v3481_v5 }
  0x28   : > { %v443_v36 = vsel %vm3438_vm6, %v438_v23, %v442_v61  ;;  %v452_v41 = vrot.slane %v451_v25, 4  ;;  %v3528_v47 = vld [vmem:[%s3351_s14 + $0x38] sm:$0x1]  ;;  %v3533_v48 = vld [vmem:[%s4250_s3 + $0x8] sm:$0x3]  ;;  %v461_v53 = vor.u32 %v460_v12, %v456_v30  ;;  %v471_v55 = vrot.slane %v469_v37, 4 }
  0x29   : > { %1738 = vst.msk [vmem:[#allocation2 + $0x8] sm:$0x1] %vm1737_vm5, %v3517_v35  ;;  %v1742_v49 = vld [vmem:[%s3495_s7] sm:$0xf]  ;;  %v1743_v51 = vld [vmem:[%s3495_s7 + $0x4] sm:$0xf]  ;;  %v3539_v52 = vcombine.low %v433_v22, %v443_v36 }
  0x2a   : > { %v474_v56 = vrot.slane %v472_v38, 5  ;;  %v1744_v57 = vld [vmem:[%s3495_s7 + $0x8] sm:$0x1]  ;;  %1746 = vst.msk [vmem:[#allocation2 + $0x18] sm:$0xf] %vm1734_vm4, %v1742_v49  ;;  %v457_v61 = vsel %vm3438_vm6, %v452_v41, %v456_v30  ;;  %v478_v1 = vshll.u32 %v3423_v34, 16 }
  0x2b   : > { %1747 = vst.msk [vmem:[#allocation2 + $0x1c] sm:$0xf] %vm1734_vm4, %v1743_v51  ;;  %v1749_v60 = vld [vmem:[%s3508_s10] sm:$0xf]  ;;  %v484_v37 = vrot.slane %v482_v42, 4  ;;  %v488_v2 = vshll.u32 %v3490_v18, 16  ;;  %2976 = vmatmul.mubr.msk.bf16.vlgmr.msra.gmra.mxu0 %vm692_vm1, %v3539_v52 }
  0x2c   : > { %1748 = vst.msk [vmem:[#allocation2 + $0x20] sm:$0x1] %vm1737_vm5, %v1744_v57  ;;  %v1750_v38 = vld [vmem:[%s3508_s10 + $0x4] sm:$0xf]  ;;  %v462_v3 = vrot.slane %v461_v53, 4  ;;  %v475_v4 = vor.u32 %v474_v56, %v471_v55  ;;  %v495_v9 = vrot.slane %v493_v54, 4  ;;  %3002 = vmatpush3.bf16.msra.mxu0 %v3378_v15  ;;  %2998 = vmatmul.mubr.msk.bf16.gmra.mxu1 %vm692_vm1, %v3525_v46 }
  0x2d   : > { %1753 = vst.msk [vmem:[#allocation2 + $0x24] sm:$0xf] %vm1734_vm4, %v1749_v60  ;;  %v498_v10 = vrot.slane %v496_v58, 5  ;;  %v1751_v42 = vld [vmem:[%s3508_s10 + $0x8] sm:$0x1]  ;;  %v480_v12 = vrot.slane %v478_v1, 5  ;;  %3017 = vmatprep.mubr.msk.bf16.mxu1 %vm692_vm1, %v3385_v16  ;;  %3157 = vmatprep.subr.msk.bf16.mxu0 %vm711_vm0, %v3533_v48 }
  0x2e   : > { %1754 = vst.msk [vmem:[#allocation2 + $0x28] sm:$0xf] %vm1734_vm4, %v1750_v38  ;;  %v490_v13 = vrot.slane %v488_v2, 5  ;;  %v502_v21 = vshll.u32 %v3455_v50, 16  ;;  %v508_v54 = vrot.slane %v506_v62, 4  ;;  %v467_v22 = vsel %vm3438_vm6, %v462_v3, %v466_v31 }
  0x2f   : > { %1755 = vst.msk [vmem:[#allocation2 + $0x2c] sm:$0x1] %vm1737_vm5, %v1751_v42  ;;  %v3574_v58 = vld [vmem:[%s3351_s14 + $0x54] sm:$0xf]  ;;  %v476_v23 = vrot.slane %v475_v4, 4  ;;  %v499_v15 = vor.u32 %v498_v10, %v495_v9  ;;  %v512_v25 = vshll.u32 %v3528_v47, 16  ;;  %v3591_v36 = vcombine.low %v457_v61, %v467_v22 }
  0x30   : > { %v3584_v30 = vld [vmem:[%s3351_s14 + $0x58] sm:$0xf]  ;;  %v3587_v62 = vld [vmem:[%s3351_s14 + $0x5c] sm:$0x1]  ;;  %1739 = vst.msk [vmem:[#allocation2 + $0xc] sm:$0xf] %vm1734_vm4, %v3574_v58  ;;  %v485_v31 = vor.u32 %v484_v37, %v480_v12 }
  0x31   : > { %v504_v41 = vrot.slane %v502_v21, 5  ;;  %v3594_v49 = vld [vmem:[%s3351_s14 + $0x44] sm:$0x1]  ;;  %v519_v16 = vrot.slane %v517_v32, 4  ;;  %1740 = vst.msk [vmem:[#allocation2 + $0x10] sm:$0xf] %vm1734_vm4, %v3584_v30  ;;  %v481_v51 = vsel %vm3438_vm6, %v476_v23, %v480_v12  ;;  %2979 = vmatprep.mubr.msk.bf16.mxu0 %vm692_vm1, %v3591_v36 }
  0x32   : > { %1741 = vst.msk [vmem:[#allocation2 + $0x14] sm:$0x1] %vm1737_vm5, %v3587_v62  ;;  %v500_v53 = vrot.slane %v499_v15, 4  ;;  %v514_v55 = vrot.slane %v512_v25, 5  ;;  %v522_v56 = vrot.slane %v520_v33, 5  ;;  %v486_v57 = vrot.slane %v485_v31, 4 }
  0x33   : > { %v509_v60 = vor.u32 %v508_v54, %v504_v41  ;;  %v526_v32 = vshll.u32 %v3481_v5, 16  ;;  %v532_v61 = vrot.slane %v530_v44, 4  ;;  %v2654_v1 = vrot.slane %v3358_v6, 9  ;;  %v2794_v21 = vld [vmem:[%s4250_s3 + $0xe] sm:$0x3] }
  0x34   : > { %v523_v37 = vor.u32 %v522_v56, %v519_v16  ;;  %v536_v2 = vshll.u32 %v3594_v49, 16  ;;  %v1267_v38 = vsel %vm711_vm0, %v3394_v19, 0  ;;  %v491_v3 = vsel %vm3438_vm6, %v486_v57, %v490_v13  ;;  %3018 = vmatmul.mubr.msk.bf16.vlgmr.msra.gmra.mxu1 %vm692_vm1, %v3413_v26 }
  0x35   : > { %v505_v33 = vsel %vm3438_vm6, %v500_v53, %v504_v41  ;;  %v510_v4 = vrot.slane %v509_v60, 4  ;;  %v528_v9 = vrot.slane %v526_v32, 5  ;;  %v619_v10 = vrot.slane %v617_v20, 4  ;;  %3021 = vmatprep.mubr.msk.bf16.mxu1 %vm692_vm1, %v3445_v43  ;;  %3044 = vmatpush3.bf16.msra.mxu1 %v1267_v38 }
  0x36   : > { %v620_v44 = vrot.slane %v3406_v24, 5  ;;  %v3618_v6 = vcombine.low %v481_v51, %v491_v3  ;;  %v524_v42 = vrot.slane %v523_v37, 4  ;;  %v538_v13 = vrot.slane %v536_v2, 5  ;;  %v2732_v24 = vld [vmem:[%s4250_s3 + $0xe] sm:$0x3] }
  0x37   : > { %v515_v12 = vsel %vm3438_vm6, %v510_v4, %v514_v55  ;;  %v533_v19 = vor.u32 %v532_v61, %v528_v9  ;;  %v624_v22 = vrot.slane %v3369_v11, 5  ;;  %v618_v25 = vsel %vm3626_vm9, %v2654_v1, %v617_v20  ;;  %3160 = vmatprep.subr.msk.bf16.mxu1 %vm711_vm0, %v2732_v24  ;;  %v2724_v4 = vld [vmem:[%s4250_s3 + $0xc] sm:$0x3] }
  0x38   : > { %2980 = vmatmul.mubr.msk.bf16.gmra.mxu0 %vm692_vm1, %v3618_v6  ;;  %v3635_v54 = vcombine.low %v505_v33, %v515_v12  ;;  %v529_v23 = vsel %vm3438_vm6, %v524_v42, %v528_v9  ;;  %v621_v31 = vsel %vm3626_vm9, %v619_v10, %v620_v44  ;;  %v631_v41 = vrot.slane %v3388_v17, 5 }
  0x39   : > { %v534_v15 = vrot.slane %v533_v19, 4  ;;  %v2655_v51 = vrot.slane %v3364_v8, 9  ;;  %v626_v53 = vrot.slane %v624_v22, 4  ;;  %v627_v7 = vrot.slane %v3431_v39, 5 }
  0x3a   : > { %2983 = vmatprep.mubr.msk.bf16.mxu0 %vm692_vm1, %v3635_v54  ;;  %v2688_v55 = vcombine.low %v618_v25, %v621_v31  ;;  %v2656_v20 = vrot.slane %v3375_v14, 9  ;;  %v633_v56 = vrot.slane %v631_v41, 4  ;;  %v634_v57 = vrot.slane %v3466_v59, 5 }
  0x3b   : > { %v539_v11 = vsel %vm3438_vm6, %v534_v15, %v538_v13  ;;  %v625_v8 = vsel %vm3626_vm9, %v2655_v51, %v624_v22  ;;  %v628_v14 = vsel %vm3626_vm9, %v626_v53, %v627_v7  ;;  %v638_v17 = vrot.slane %v3423_v34, 5 }
  0x3c   : > { %v3654_v16 = vcombine.low %v529_v23, %v539_v11  ;;  %3022 = vmatmul.mubr.msk.bf16.gmra.mxu1 %vm692_vm1, %v3472_v63  ;;  %v632_v39 = vsel %vm3626_vm9, %v2656_v20, %v631_v41  ;;  %v635_v59 = vsel %vm3626_vm9, %v633_v56, %v634_v57  ;;  %v645_v60 = vrot.slane %v3455_v50, 5 }
  0x3d   : > { %3025 = vmatprep.mubr.msk.bf16.mxu1 %vm692_vm1, %v3525_v46  ;;  %v3679_v32 = vcombine.low %v3500_v27, %v3503_v28  ;;  %v2689_v61 = vcombine.low %v625_v8, %v628_v14  ;;  %v3681_v1 = vcombine.low %v632_v39, %v635_v59  ;;  %v2657_v37 = vrot.slane %v3416_v29, 9 }
  0x3e   : > { %v640_v2 = vrot.slane %v638_v17, 4  ;;  %v641_v34 = vrot.slane %v3490_v18, 5  ;;  %v1163_v38 = vsel %vm711_vm0, %v3533_v48, 0  ;;  %v2658_v3 = vrot.slane %v3448_v45, 9 }
  0x3f   : > { %v647_v33 = vrot.slane %v645_v60, 4  ;;  %v648_v50 = vrot.slane %v3528_v47, 5  ;;  %v639_v29 = vsel %vm3626_vm9, %v2657_v37, %v638_v17  ;;  %v652_v18 = vrot.slane %v3481_v5, 5  ;;  %v3720_v5 = vld [vmem:[%s4250_s3 + $0x2] sm:$0x3] }
  0x40   : > { %2984 = vmatmul.mubr.msk.bf16.gmra.mxu0 %vm692_vm1, %v3654_v16  ;;  %v642_v45 = vsel %vm3626_vm9, %v640_v2, %v641_v34  ;;  %v646_v47 = vsel %vm3626_vm9, %v2658_v3, %v645_v60  ;;  %v2659_v44 = vrot.slane %v3475_v0, 9  ;;  %v655_v12 = vrot.slane %v3594_v49, 5  ;;  %v3775_v34 = vld [vmem:[#allocation2] sm:$0xf] }
  0x41   : > { %3003 = vmatprep.mubr.msk.bf16.mxu0 %vm692_vm1, %v2688_v55  ;;  %v649_v48 = vsel %vm3626_vm9, %v647_v33, %v648_v50  ;;  %v3708_v9 = vcombine.low %v639_v29, %v642_v45  ;;  %v654_v42 = vrot.slane %v652_v18, 4  ;;  %v1475_v19 = vsel %vm711_vm0, %v2732_v24, 0  ;;  %v3784_v33 = vld [vmem:[%s4250_s3 + $0x10] sm:$0x3] }
  0x42   : > { %v3710_v10 = vcombine.low %v646_v47, %v649_v48  ;;  %v659_v0 = vrot.slane %v3503_v28, 5  ;;  %v2725_v49 = vcombine.low %v3574_v58, %v3584_v30  ;;  %v653_v13 = vsel %vm3626_vm9, %v2659_v44, %v652_v18 }
  0x43   : > { %v656_v24 = vsel %vm3626_vm9, %v654_v42, %v655_v12  ;;  %v2660_v23 = vrot.slane %v3500_v27, 9  ;;  %v662_v25 = vrot.slane %v3517_v35, 5  ;;  %v2661_v31 = vrot.slane %v3574_v58, 9 }
  0x44   : > { %3026 = vmatmul.mubr.msk.bf16.gmra.mxu1 %vm692_vm1, %v3679_v32  ;;  %v3737_v22 = vcombine.low %v653_v13, %v656_v24  ;;  %v661_v15 = vrot.slane %v659_v0, 4  ;;  %v541_v41 = vshrl.u32 %v3500_v27, 16  ;;  %v544_v11 = vshll.u32 %v3500_v27, 16  ;;  %v3801_v13 = vld [vmem:[#allocation2 + $0xc] sm:$0xf] }
  0x45   : > { %3045 = vmatprep.mubr.msk.bf16.mxu1 %vm692_vm1, %v2689_v61  ;;  %v666_v51 = vrot.slane %v3584_v30, 5  ;;  %v550_v53 = vshll.u32 %v3503_v28, 16  ;;  %v554_v7 = vshrl.u32 %v3503_v28, 16  ;;  %v669_v55 = vrot.slane %v3587_v62, 5 }
  0x46   : > { %v660_v27 = vsel %vm3626_vm9, %v2660_v23, %v659_v0  ;;  %v663_v20 = vsel %vm3626_vm9, %v661_v15, %v662_v25  ;;  %v543_v28 = vrot.slane %v541_v41, 4  ;;  %v546_v8 = vrot.slane %v544_v11, 5 }
  0x47   : > { %v3760_v56 = vsel %vm3626_vm9, %v2661_v31, %v666_v51  ;;  %v668_v57 = vrot.slane %v666_v51, 4  ;;  %v3768_v17 = vcombine.low %v660_v27, %v663_v20  ;;  %v552_v39 = vrot.slane %v550_v53, 5  ;;  %v3803_v31 = vld [vmem:[#allocation2 + $0x10] sm:$0xf]  ;;  %v3808_v51 = vld [vmem:[#allocation2 + $0x8] sm:$0x1] }
  0x48   : > { %3004 = vmatmul.mubr.msk.bf16.vlgmr.msra.gmra.mxu0 %vm692_vm1, %v2689_v61  ;;  %v556_v59 = vrot.slane %v554_v7, 4  ;;  %v1371_v61 = vsel %vm711_vm0, %v2724_v4, 0  ;;  %v547_v37 = vor.u32 %v546_v8, %v543_v28  ;;  %v560_v2 = vshll.u32 %v3517_v35, 16  ;;  %v1904_v20 = vld [vmem:[%s4250_s3] sm:$0x3] }
  0x49   : > { %3030 = vmatpush3.bf16.msra.mxu0 %v1163_v38  ;;  %3007 = vmatprep.mubr.msk.bf16.mxu0 %vm692_vm1, %v3681_v1  ;;  %v3766_v14 = vsel %vm3626_vm9, %v668_v57, %v669_v55  ;;  %v3777_v38 = vld [vmem:[#allocation2 + $0x4] sm:$0xf]  ;;  %v568_v50 = vshll.u32 %v3574_v58, 16  ;;  %v578_v35 = vshrl.u32 %v3584_v30, 16  ;;  %v1769_v29 = vshrl.u32 %v3775_v34, 16 }
  0x4a   : > { %3159 = vmatprep.subr.msk.bf16.mxu0 %vm711_vm0, %v2724_v4  ;;  %v2741_v60 = vcombine.low %v3760_v56, %v3766_v14  ;;  %v557_v3 = vor.u32 %v556_v59, %v552_v39  ;;  %v574_v4 = vshll.u32 %v3584_v30, 16  ;;  %v1772_v45 = vshll.u32 %v3775_v34, 16 }
  0x4b   : > { %v1778_v18 = vshll.u32 %v3777_v38, 16  ;;  %v1782_v47 = vshrl.u32 %v3777_v38, 16  ;;  %v548_v48 = vrot.slane %v547_v37, 4  ;;  %v562_v44 = vrot.slane %v560_v2, 5 }
  0x4c   : > { %3046 = vmatmul.mubr.msk.bf16.vlgmr.msra.gmra.mxu1 %vm692_vm1, %v3681_v1  ;;  %v558_v12 = vrot.slane %v557_v3, 4  ;;  %v580_v0 = vrot.slane %v578_v35, 4  ;;  %v1771_v24 = vrot.slane %v1769_v29, 4  ;;  %v1774_v23 = vrot.slane %v1772_v45, 5  ;;  %v3831_v45 = vld [vmem:[#allocation2 + $0x14] sm:$0x1] }
  0x4d   : > { %3049 = vmatprep.mubr.msk.bf16.mxu1 %vm692_vm1, %v3708_v9  ;;  %3072 = vmatpush3.bf16.msra.mxu1 %v1475_v19  ;;  %v576_v19 = vrot.slane %v574_v4, 5  ;;  %v1780_v15 = vrot.slane %v1778_v18, 5  ;;  %v1784_v25 = vrot.slane %v1782_v47, 4  ;;  %v1919_v41 = vsel %vm711_vm0, %v3720_v5, 0 }
  0x4e   : > { %3162 = vmatprep.subr.msk.bf16.mxu1 %vm711_vm0, %v3720_v5  ;;  %v584_v11 = vshll.u32 %v3587_v62, 16  ;;  %v553_v53 = vsel %vm3438_vm6, %v548_v48, %v552_v39  ;;  %v563_v7 = vsel %vm3438_vm6, %v558_v12, %v562_v44  ;;  %v1793_v62 = vshrl.u32 %v3801_v13, 16 }
  0x4f   : > { %v581_v27 = vor.u32 %v580_v0, %v576_v19  ;;  %v1802_v5 = vshll.u32 %v3803_v31, 16  ;;  %v1806_v57 = vshrl.u32 %v3803_v31, 16  ;;  %v1775_v28 = vor.u32 %v1774_v23, %v1771_v24 }
  0x50   : > { %3008 = vmatmul.mubr.msk.bf16.gmra.mxu0 %vm692_vm1, %v3708_v9  ;;  %v1785_v8 = vor.u32 %v1784_v25, %v1780_v15  ;;  %v1788_v39 = vshll.u32 %v3808_v51, 16  ;;  %v2709_v59 = vcombine.low %v553_v53, %v563_v7  ;;  %v586_v37 = vrot.slane %v584_v11, 5  ;;  %v3868_v7 = vld [vmem:[#allocation2 + $0x18] sm:$0xf] }
  0x51   : > { %3011 = vmatprep.mubr.msk.bf16.mxu0 %vm692_vm1, %v3710_v10  ;;  %v1795_v2 = vrot.slane %v1793_v62, 4  ;;  %v1804_v3 = vrot.slane %v1802_v5, 5  ;;  %v1776_v4 = vrot.slane %v1775_v28, 4  ;;  %v1579_v25 = vsel %vm711_vm0, %v3784_v33, 0 }
  0x52   : > { %v1786_v35 = vrot.slane %v1785_v8, 4  ;;  %v1790_v29 = vrot.slane %v1788_v39, 5  ;;  %v1983_v53 = vsel %vm711_vm0, %v1904_v20, 0  ;;  %v1820_v5 = vshll.u32 %v3868_v7, 16 }
  0x53   : > { %v3895_v28 = vcombine.low %v3801_v13, %v3803_v31  ;;  %v2761_v8 = vrot.slane %v3801_v13, 9 }
  0x54   : > { %3050 = vmatmul.mubr.msk.bf16.gmra.mxu1 %vm692_vm1, %v3710_v10  ;;  %v1791_v12 = vsel %vm3438_vm6, %v1786_v35, %v1790_v29 }
  0x55   : > { %3053 = vmatprep.mubr.msk.bf16.mxu1 %vm692_vm1, %v3737_v22 }
  0x58   : > { %3012 = vmatmul.mubr.msk.bf16.gmra.mxu0 %vm692_vm1, %v3737_v22 }
  0x59   : > { %3031 = vmatprep.mubr.msk.bf16.mxu0 %vm692_vm1, %v3539_v52  ;;  %v565_v52 = vshrl.u32 %v3574_v58, 16 }
  0x5b   : > { %v567_v42 = vrot.slane %v565_v52, 4 }
  0x5c   : > { %3054 = vmatmul.mubr.msk.bf16.gmra.mxu1 %vm692_vm1, %v3768_v17 }
  0x5d   : > { %3073 = vmatprep.mubr.msk.bf16.mxu1 %vm692_vm1, %v3591_v36 }
  0x60   : > { %3032 = vmatmul.mubr.msk.bf16.vlgmr.msra.gmra.mxu0 %vm692_vm1, %v3591_v36  ;;  %v570_v36 = vrot.slane %v568_v50, 5  ;;  %v1808_v50 = vrot.slane %v1806_v57, 4 }
  0x61   : > { %3058 = vmatpush3.bf16.msra.mxu0 %v1371_v61  ;;  %3035 = vmatprep.mubr.msk.bf16.mxu0 %vm692_vm1, %v3618_v6  ;;  %v582_v61 = vrot.slane %v581_v27, 4  ;;  %v2760_v27 = vrot.slane %v3775_v34, 9 }
  0x62   : > { %3161 = vmatprep.subr.msk.bf16.mxu0 %vm711_vm0, %v3784_v33  ;;  %v571_v55 = vor.u32 %v570_v36, %v567_v42  ;;  %v1809_v44 = vor.u32 %v1808_v50, %v1804_v3  ;;  %v1812_v42 = vshll.u32 %v3831_v45, 16  ;;  %v1878_v33 = vrot.slane %v3777_v38, 5 }
  0x63   : > { %v587_v47 = vsel %vm3438_vm6, %v582_v61, %v586_v37 }
  0x64   : > { %3074 = vmatmul.mubr.msk.bf16.vlgmr.msra.gmra.mxu1 %vm692_vm1, %v3618_v6  ;;  %v1796_v6 = vshll.u32 %v3801_v13, 16  ;;  %v1810_v24 = vrot.slane %v1809_v44, 4  ;;  %v1814_v23 = vrot.slane %v1812_v42, 5  ;;  %v1880_v62 = vrot.slane %v1878_v33, 4  ;;  %v2782_v13 = vld [vmem:[%s4250_s3 + $0x8] sm:$0x3] }
  0x65   : > { %3077 = vmatprep.mubr.msk.bf16.mxu1 %vm692_vm1, %v3635_v54  ;;  %3100 = vmatpush3.bf16.msra.mxu1 %v1919_v41  ;;  %v1879_v57 = vsel %vm3626_vm9, %v2760_v27, %v1878_v33  ;;  %v2790_v42 = vld [vmem:[%s4250_s3 + $0xc] sm:$0x3] }
  0x66   : > { %3163 = vmatprep.subr.msk.bf16.mxu1 %vm711_vm0, %v1904_v20  ;;  %v1798_v52 = vrot.slane %v1796_v6, 5  ;;  %v1815_v41 = vsel %vm3438_vm6, %v1810_v24, %v1814_v23  ;;  %v1881_v6 = vrot.slane %v3808_v51, 5  ;;  %v1885_v20 = vrot.slane %v3803_v31, 5 }
  0x67   : > { %v2762_v24 = vrot.slane %v3868_v7, 9 }
  0x68   : > { %3036 = vmatmul.mubr.msk.bf16.gmra.mxu0 %vm692_vm1, %v3635_v54  ;;  %v572_v54 = vrot.slane %v571_v55, 4  ;;  %v1799_v48 = vor.u32 %v1798_v52, %v1795_v2  ;;  %v3870_v55 = vld [vmem:[#allocation2 + $0x1c] sm:$0xf]  ;;  %v1887_v39 = vrot.slane %v1885_v20, 4  ;;  %v1886_v31 = vsel %vm3626_vm9, %v2761_v8, %v1885_v20 }
  0x69   : > { %3039 = vmatprep.mubr.msk.bf16.mxu0 %vm692_vm1, %v3654_v16  ;;  %v1830_v51 = vshrl.u32 %v3870_v55, 16 }
  0x6a   : > { %v577_v18 = vsel %vm3438_vm6, %v572_v54, %v576_v19  ;;  %v1800_v0 = vrot.slane %v1799_v48, 4  ;;  %v1822_v54 = vrot.slane %v1820_v5, 5 }
  0x6b   : > { %v2733_v36 = vcombine.low %v577_v18, %v587_v47  ;;  %v1832_v37 = vrot.slane %v1830_v51, 4 }
  0x6c   : > { %3078 = vmatmul.mubr.msk.bf16.gmra.mxu1 %vm692_vm1, %v3654_v16  ;;  %v1781_v16 = vsel %vm3438_vm6, %v1776_v4, %v1780_v15  ;;  %v1805_v15 = vsel %vm3438_vm6, %v1800_v0, %v1804_v3  ;;  %v1764_v3 = vld [vmem:[#allocation2 + $0x20] sm:$0x1]  ;;  %v1765_v0 = vld [vmem:[#allocation2 + $0x24] sm:$0xf] }
  0x6d   : > { %3081 = vmatprep.mubr.msk.bf16.mxu1 %vm692_vm1, %v2709_v59  ;;  %v2765_v19 = vcombine.low %v1781_v16, %v1791_v12  ;;  %v2766_v11 = vcombine.low %v1805_v15, %v1815_v41  ;;  %v1836_v29 = vshll.u32 %v1764_v3, 16  ;;  %v1892_v16 = vrot.slane %v3870_v55, 5  ;;  %v1767_v15 = vld [vmem:[#allocation2 + $0x2c] sm:$0x1] }
  0x6e   : > { %v2300_v12 = vsel %vm711_vm0, %v2790_v42, 0  ;;  %v2763_v33 = vrot.slane %v1765_v0, 9 }
  0x6f   : > { %v1838_v30 = vrot.slane %v1836_v29, 5  ;;  %v1894_v23 = vrot.slane %v1892_v16, 4 }
  0x70   : > { %3040 = vmatmul.mubr.msk.bf16.gmra.mxu0 %vm692_vm1, %v2709_v59  ;;  %v1888_v59 = vrot.slane %v3831_v45, 5 }
  0x71   : > { %3059 = vmatprep.mubr.msk.bf16.mxu0 %vm692_vm1, %v3413_v26  ;;  %v2778_v26 = vld [vmem:[%s4250_s3 + $0x6] sm:$0x3] }
  0x72   : > { %v1889_v50 = vsel %vm3626_vm9, %v1887_v39, %v1888_v59  ;;  %v2111_v47 = vsel %vm711_vm0, %v2778_v26, 0  ;;  %v2363_v59 = vsel %vm711_vm0, %v2794_v21, 0 }
  0x73   : > { %v3917_v45 = vcombine.low %v1886_v31, %v1889_v50 }
  0x74   : > { %3082 = vmatmul.mubr.msk.bf16.gmra.mxu1 %vm692_vm1, %v2733_v36  ;;  %v2779_v36 = vcombine.low %v3868_v7, %v3870_v55 }
  0x75   : > { %3101 = vmatprep.mubr.msk.bf16.mxu1 %vm692_vm1, %v2765_v19  ;;  %v1766_v19 = vld [vmem:[#allocation2 + $0x28] sm:$0xf] }
  0x76   : > { %v2791_v41 = vcombine.low %v1765_v0, %v1766_v19  ;;  %v1850_v20 = vshll.u32 %v1766_v19, 16 }
  0x78   : > { %3060 = vmatmul.mubr.msk.bf16.vlgmr.msra.gmra.mxu0 %vm692_vm1, %v3445_v43  ;;  %v2769_v43 = vcombine.low %v3775_v34, %v3777_v38  ;;  %v1817_v38 = vshrl.u32 %v3868_v7, 16  ;;  %v1826_v34 = vshll.u32 %v3870_v55, 16 }
  0x79   : > { %3086 = vmatpush3.bf16.msra.mxu0 %v1579_v25  ;;  %3063 = vmatprep.mubr.msk.bf16.mxu0 %vm692_vm1, %v3472_v63  ;;  %v2773_v63 = vld [vmem:[%s4250_s3 + $0x4] sm:$0x3]  ;;  %v1895_v25 = vrot.slane %v1764_v3, 5 }
  0x7a   : > { %3165 = vmatprep.subr.msk.bf16.mxu0 %vm711_vm0, %v2778_v26  ;;  %v1828_v61 = vrot.slane %v1826_v34, 5  ;;  %v2048_v2 = vsel %vm711_vm0, %v2773_v63, 0  ;;  %v1899_v26 = vrot.slane %v1766_v19, 5 }
  0x7c   : > { %3102 = vmatmul.mubr.msk.bf16.vlgmr.msra.gmra.mxu1 %vm692_vm1, %v2766_v11  ;;  %v1833_v35 = vor.u32 %v1832_v37, %v1828_v61  ;;  %v1900_v55 = vsel %vm3626_vm9, %v2763_v33, %v1899_v26 }
  0x7d   : > { %3106 = vmatpush3.bf16.msra.mxu1 %v1983_v53  ;;  %3107 = vmatprep.mubr.msk.bf16.mxu1 %vm692_vm1, %v2769_v43  ;;  %v1901_v53 = vrot.slane %v1899_v26, 4  ;;  %v1902_v43 = vrot.slane %v1767_v15, 5 }
  0x7e   : > { %3164 = vmatprep.subr.msk.bf16.mxu1 %vm711_vm0, %v2773_v63  ;;  %v1834_v58 = vrot.slane %v1833_v35, 4  ;;  %v1854_v63 = vshrl.u32 %v1766_v19, 16 }
  0x7f   : > { %v1903_v27 = vsel %vm3626_vm9, %v1901_v53, %v1902_v43 }
  0x80   : > { %3064 = vmatmul.mubr.msk.bf16.gmra.mxu0 %vm692_vm1, %v3525_v46  ;;  %v1882_v46 = vsel %vm3626_vm9, %v1880_v62, %v1881_v6  ;;  %v1839_v44 = vsel %vm3438_vm6, %v1834_v58, %v1838_v30  ;;  %v1841_v62 = vshrl.u32 %v1765_v0, 16  ;;  %v1844_v6 = vshll.u32 %v1765_v0, 16 }
  0x81   : > { %3067 = vmatprep.mubr.msk.bf16.mxu0 %vm692_vm1, %v3679_v32  ;;  %v1819_v32 = vrot.slane %v1817_v38, 4  ;;  %v2774_v52 = vcombine.low %v1879_v57, %v1882_v46  ;;  %v2799_v38 = vcombine.low %v1900_v55, %v1903_v27  ;;  %v1856_v5 = vrot.slane %v1854_v63, 4 }
  0x82   : > { %v1843_v56 = vrot.slane %v1841_v62, 4  ;;  %v1846_v14 = vrot.slane %v1844_v6, 5  ;;  %v1860_v46 = vshll.u32 %v1767_v15, 16 }
  0x83   : > { %v1823_v4 = vor.u32 %v1822_v54, %v1819_v32 }
  0x84   : > { %3108 = vmatmul.mubr.msk.bf16.vlgmr.msra.gmra.mxu1 %vm692_vm1, %v3895_v28  ;;  %v1847_v51 = vor.u32 %v1846_v14, %v1843_v56  ;;  %v1862_v39 = vrot.slane %v1860_v46, 5 }
  0x85   : > { %3112 = vmatpush3.bf16.msra.mxu1 %v2048_v2  ;;  %3113 = vmatprep.mubr.msk.bf16.mxu1 %vm692_vm1, %v2774_v52  ;;  %v1824_v18 = vrot.slane %v1823_v4, 4 }
  0x86   : > { %3166 = vmatprep.subr.msk.bf16.mxu1 %vm711_vm0, %v2782_v13 }
  0x87   : > { %v1829_v48 = vsel %vm3438_vm6, %v1824_v18, %v1828_v61 }
  0x88   : > { %3068 = vmatmul.mubr.msk.bf16.gmra.mxu0 %vm692_vm1, %v2725_v49  ;;  %v2174_v49 = vsel %vm711_vm0, %v2782_v13, 0 }
  0x89   : > { %3087 = vmatprep.mubr.msk.bf16.mxu0 %vm692_vm1, %v3681_v1  ;;  %v2786_v1 = vld [vmem:[%s4250_s3 + $0xa] sm:$0x3] }
  0x8a   : > { %v2237_v34 = vsel %vm711_vm0, %v2786_v1, 0 }
  0x8c   : > { %3114 = vmatmul.mubr.msk.bf16.vlgmr.msra.gmra.mxu1 %vm692_vm1, %v3917_v45 }
  0x8d   : > { %3124 = vmatpush3.bf16.msra.mxu1 %v2174_v49  ;;  %3125 = vmatprep.mubr.msk.bf16.mxu1 %vm692_vm1, %v2766_v11  ;;  %v1896_v11 = vsel %vm3626_vm9, %v1894_v23, %v1895_v25 }
  0x8e   : > { %3168 = vmatprep.subr.msk.bf16.mxu1 %vm711_vm0, %v2790_v42 }
  0x90   : > { %3088 = vmatmul.mubr.msk.bf16.vlgmr.msra.gmra.mxu0 %vm692_vm1, %v3708_v9  ;;  %v2783_v9 = vcombine.low %v1829_v48, %v1839_v44 }
  0x91   : > { %3118 = vmatpush3.bf16.msra.mxu0 %v2111_v47  ;;  %3091 = vmatprep.mubr.msk.bf16.mxu0 %vm692_vm1, %v3710_v10  ;;  %v2798_v10 = vld [vmem:[%s4250_s3 + $0x10] sm:$0x3] }
  0x92   : > { %3167 = vmatprep.subr.msk.bf16.mxu0 %vm711_vm0, %v2786_v1  ;;  %v2426_v7 = vsel %vm711_vm0, %v2798_v10, 0 }
  0x94   : > { %3126 = vmatmul.mubr.msk.bf16.vlgmr.msra.gmra.mxu1 %vm692_vm1, %v2783_v9 }
  0x95   : > { %3136 = vmatpush3.bf16.msra.mxu1 %v2300_v12  ;;  %3137 = vmatprep.mubr.msk.bf16.mxu1 %vm692_vm1, %v2779_v36 }
  0x96   : > { %3170 = vmatprep.subr.msk.bf16.mxu1 %vm711_vm0, %v2798_v10 }
  0x98   : > { %3092 = vmatmul.mubr.msk.bf16.gmra.mxu0 %vm692_vm1, %v3737_v22  ;;  %v1893_v22 = vsel %vm3626_vm9, %v2762_v24, %v1892_v16 }
  0x99   : > { %3095 = vmatprep.mubr.msk.bf16.mxu0 %vm692_vm1, %v3768_v17  ;;  %v2787_v17 = vcombine.low %v1893_v22, %v1896_v11 }
  0x9c   : > { %3138 = vmatmul.mubr.msk.bf16.vlgmr.msra.gmra.mxu1 %vm692_vm1, %v2791_v41 }
  0x9d   : > { %3148 = vmatpush3.bf16.msra.mxu1 %v2426_v7  ;;  %3149 = vmatprep.mubr.msk.bf16.mxu1 %vm692_vm1, %v2787_v17 }
  0xa0   : > { %3096 = vmatmul.mubr.msk.bf16.gmra.mxu0 %vm692_vm1, %v2741_v60  ;;  %v1852_v60 = vrot.slane %v1850_v20, 5 }
  0xa1   : > { %3119 = vmatprep.mubr.msk.bf16.mxu0 %vm692_vm1, %v3895_v28  ;;  %v1848_v28 = vrot.slane %v1847_v51, 4 }
  0xa2   : > { %v1857_v57 = vor.u32 %v1856_v5, %v1852_v60 }
  0xa3   : > { %v1853_v32 = vsel %vm3438_vm6, %v1848_v28, %v1852_v60 }
  0xa4   : > { %3150 = vmatmul.mubr.msk.bf16.vlgmr.msra.gmra.mxu1 %vm692_vm1, %v2799_v38  ;;  %v1858_v8 = vrot.slane %v1857_v57, 4 }
  0xa6   : > { %v1863_v54 = vsel %vm3438_vm6, %v1858_v8, %v1862_v39 }
  0xa7   : > { %v2795_v61 = vcombine.low %v1853_v32, %v1863_v54 }
  0xa8   : > { %3120 = vmatmul.mubr.msk.bf16.vlgmr.msra.gmra.mxu0 %vm692_vm1, %v2779_v36 }
  0xa9   : > { %3130 = vmatpush3.bf16.msra.mxu0 %v2237_v34  ;;  %3131 = vmatprep.mubr.msk.bf16.mxu0 %vm692_vm1, %v3917_v45 }
  0xaa   : > { %3169 = vmatprep.subr.msk.bf16.mxu0 %vm711_vm0, %v2794_v21 }
  0xb0   : > { %3132 = vmatmul.mubr.msk.bf16.vlgmr.msra.gmra.mxu0 %vm692_vm1, %v2787_v17 }
  0xb1   : > { %3142 = vmatpush3.bf16.msra.mxu0 %v2363_v59  ;;  %3143 = vmatprep.mubr.msk.bf16.mxu0 %vm692_vm1, %v2783_v9 }
  0xb8   : > { %3144 = vmatmul.mubr.msk.bf16.vlgmr.msra.gmra.mxu0 %vm692_vm1, %v2795_v61 }
  0xdc   : > { %v2991_v37 = vpop.f32.mrf.mxu1 }
  0xde   : > { %v869_v2 = vpop.f32.mrf.mxu1 }
  0xe0   : > { %v2992_v52 = vpop.f32.mrf.mxu1 }
  0xe2   : > { %v872_v3 = vpop.f32.mrf.mxu1 }
  0xe4   : > { %v2995_v31 = vpop.f32.mrf.mxu1 }
  0xe6   : > { %v885_v13 = vpop.f32.mrf.mxu1 }
  0xe8   : > { %v2996_v50 = vpop.f32.mrf.mxu1 }
  0xea   : > { %v888_v4 = vpop.f32.mrf.mxu1 }
  0xeb   : > { %v2977_v35 = vpop.f32.mrf.mxu0 }
  0xec   : > { %v878_v29 = vadd.f32 %v2991_v37, %v2977_v35  ;;  %v2999_v45 = vpop.f32.mrf.mxu1 }
  0xed   : > { %v749_v18 = vpop.f32.mrf.mxu0 }
  0xee   : > { %v870_v58 = vadd.f32 %v869_v2, %v749_v18  ;;  %v901_v30 = vpop.f32.mrf.mxu1 }
  0xef   : > { %v2978_v49 = vpop.f32.mrf.mxu0 }
  0xf0   : > { %v3989_v40 = vadd.f32 %v2992_v52, %v2978_v49  ;;  %v3000_v47 = vpop.f32.mrf.mxu1 }
  0xf1   : > { %v752_v1 = vpop.f32.mrf.mxu0 }
  0xf2   : > { %v3991_v48 = vadd.f32 %v872_v3, %v752_v1  ;;  %v904_v44 = vpop.f32.mrf.mxu1 }
  0xf4   : > { %v3019_v42 = vpop.f32.mrf.mxu1 }
  0xf6   : > { %v1095_v12 = vpop.f32.mrf.mxu1 }
  0xf8   : > { %v2981_v9 = vpop.f32.mrf.mxu0  ;;  %v3993_v10 = vpop.f32.mrf.mxu1 }
  0xf9   : > { %v894_v16 = vadd.f32 %v2995_v31, %v2981_v9 }
  0xfa   : > { %v765_v36 = vpop.f32.mrf.mxu0  ;;  %v3997_v23 = vpop.f32.mrf.mxu1 }
  0xfb   : > { %v886_v19 = vadd.f32 %v885_v13, %v765_v36 }
  0xfc   : > { %v2982_v0 = vpop.f32.mrf.mxu0  ;;  %v3023_v15 = vpop.f32.mrf.mxu1 }
  0xfd   : > { %v3995_v24 = vadd.f32 %v2996_v50, %v2982_v0 }
  0xfe   : > { %v768_v25 = vpop.f32.mrf.mxu0  ;;  %v1111_v22 = vpop.f32.mrf.mxu1 }
  0xff   : > { %v3999_v26 = vadd.f32 %v888_v4, %v768_v25 }
 0x100   : > { %v2985_v41 = vpop.f32.mrf.mxu0  ;;  %v4001_v43 = vpop.f32.mrf.mxu1 }
 0x101   : > { %v910_v33 = vadd.f32 %v2999_v45, %v2985_v41 }
 0x102   : > { %v781_v11 = vpop.f32.mrf.mxu0  ;;  %v4005_v55 = vpop.f32.mrf.mxu1 }
 0x103   : > { %v902_v53 = vadd.f32 %v901_v30, %v781_v11 }
 0x104   : > { %v2986_v7 = vpop.f32.mrf.mxu0  ;;  %v3027_v6 = vpop.f32.mrf.mxu1 }
 0x105   : > { %v4003_v17 = vadd.f32 %v3000_v47, %v2986_v7 }
 0x106   : > { %v784_v27 = vpop.f32.mrf.mxu0  ;;  %v1127_v38 = vpop.f32.mrf.mxu1 }
 0x107   : > { %v4007_v62 = vadd.f32 %v904_v44, %v784_v27 }
 0x108   : > { %v3005_v63 = vpop.f32.mrf.mxu0  ;;  %v4009_v60 = vpop.f32.mrf.mxu1 }
 0x109   : > { %v1040_v20 = vadd.f32 %v3005_v63, %v878_v29 }
 0x10a   : > { %v991_v56 = vpop.f32.mrf.mxu0  ;;  %v4015_v21 = vpop.f32.mrf.mxu1 }
 0x10b   : > { %v1038_v14 = vadd.f32 %v991_v56, %v870_v58  ;;  %v4011_v5 = vadd.f32 %v3019_v42, %v1040_v20 }
 0x10c   : > { %v4013_v34 = vpop.f32.mrf.mxu0  ;;  %v4021_v46 = vpop.f32.mrf.mxu1 }
 0x10d   : > { %v4017_v51 = vadd.f32 %v1095_v12, %v1038_v14 }
 0x10e   : > { %v4019_v57 = vpop.f32.mrf.mxu0  ;;  %v4023_v39 = vpop.f32.mrf.mxu1 }
 0x110   : > { %v3009_v28 = vpop.f32.mrf.mxu0  ;;  %v4025_v54 = vpop.f32.mrf.mxu1 }
 0x111   : > { %v1044_v8 = vadd.f32 %v3009_v28, %v894_v16 }
 0x112   : > { %v1007_v59 = vpop.f32.mrf.mxu0  ;;  %v4031_v2 = vpop.f32.mrf.mxu1 }
 0x113   : > { %v1042_v32 = vadd.f32 %v1007_v59, %v886_v19  ;;  %v4027_v61 = vadd.f32 %v3023_v15, %v1044_v8 }
 0x114   : > { %v4029_v37 = vpop.f32.mrf.mxu0  ;;  %v4037_v31 = vpop.f32.mrf.mxu1 }
 0x115   : > { %v4033_v52 = vadd.f32 %v1111_v22, %v1042_v32 }
 0x116   : > { %v4035_v3 = vpop.f32.mrf.mxu0  ;;  %v4039_v4 = vpop.f32.mrf.mxu1 }
 0x118   : > { %v3013_v13 = vpop.f32.mrf.mxu0  ;;  %v4041_v45 = vpop.f32.mrf.mxu1 }
 0x119   : > { %v1048_v50 = vadd.f32 %v3013_v13, %v910_v33 }
 0x11a   : > { %v1023_v35 = vpop.f32.mrf.mxu0  ;;  %v4047_v30 = vpop.f32.mrf.mxu1 }
 0x11b   : > { %v1046_v29 = vadd.f32 %v1023_v35, %v902_v53  ;;  %v4043_v18 = vadd.f32 %v3027_v6, %v1048_v50 }
 0x11c   : > { %v4045_v58 = vpop.f32.mrf.mxu0  ;;  %v4053_v1 = vpop.f32.mrf.mxu1 }
 0x11d   : > { %v4049_v49 = vadd.f32 %v1127_v38, %v1046_v29  ;;  %4257 = vst [vmem:[#allocation3_spill] sm:$0xff] %v4053_v1 }
 0x11e   : > { %v4051_v47 = vpop.f32.mrf.mxu0  ;;  %v4055_v42 = vpop.f32.mrf.mxu1 }
 0x11f   : > { %4258 = vst [vmem:[#allocation4_spill] sm:$0xff] %v4055_v42 }
 0x120   : > { %v3033_v44 = vpop.f32.mrf.mxu0  ;;  %v4057_v16 = vpop.f32.mrf.mxu1 }
 0x121   : > { %4259 = vst [vmem:[#allocation5_spill] sm:$0xff] %v4057_v16 }
 0x122   : > { %v1199_v9 = vpop.f32.mrf.mxu0  ;;  %v4059_v36 = vpop.f32.mrf.mxu1 }
 0x123   : > { %4260 = vst [vmem:[#allocation6_spill] sm:$0xff] %v4059_v36 }
 0x124   : > { %v3034_v12 = vpop.f32.mrf.mxu0  ;;  %v4061_v0 = vpop.f32.mrf.mxu1 }
 0x126   : > { %v1202_v19 = vpop.f32.mrf.mxu0  ;;  %v4063_v15 = vpop.f32.mrf.mxu1 }
 0x128   : > { %v3037_v25 = vpop.f32.mrf.mxu0  ;;  %v4067_v33 = vpop.f32.mrf.mxu1 }
 0x12a   : > { %v4065_v41 = vpop.f32.mrf.mxu0  ;;  %v4069_v11 = vpop.f32.mrf.mxu1 }
 0x12c   : > { %v3038_v22 = vpop.f32.mrf.mxu0  ;;  %v4073_v7 = vpop.f32.mrf.mxu1 }
 0x12d   : > { %4261 = vst [vmem:[#allocation7_spill] sm:$0xff] %v4073_v7 }
 0x12e   : > { %v4071_v53 = vpop.f32.mrf.mxu0  ;;  %v4077_v6 = vpop.f32.mrf.mxu1 }
 0x12f   : > { %4262 = vst [vmem:[#allocation8_spill] sm:$0xff] %v4077_v6 }
 0x130   : > { %v4075_v27 = vpop.f32.mrf.mxu0  ;;  %v4081_v20 = vpop.f32.mrf.mxu1 }
 0x131   : > { %4263 = vst [vmem:[#allocation9_spill] sm:$0xff] %v4081_v20 }
 0x132   : > { %v4079_v63 = vpop.f32.mrf.mxu0  ;;  %v4085_v56 = vpop.f32.mrf.mxu1 }
 0x133   : > { %4264 = vst [vmem:[#allocation10_spill] sm:$0xff] %v4085_v56 }
 0x134   : > { %v4083_v38 = vpop.f32.mrf.mxu0  ;;  %v4089_v28 = vpop.f32.mrf.mxu1 }
 0x135   : > { %4265 = vst [vmem:[#allocation11_spill] sm:$0xff] %v4089_v28  ;;  %v1041_v28 = vadd.f32 %v4013_v34, %v3989_v40  ;;  %v1248_v40 = vadd.f32 %v3033_v44, %v4011_v5 }
 0x136   : > { %v4087_v14 = vpop.f32.mrf.mxu0  ;;  %v4091_v59 = vpop.f32.mrf.mxu1 }
 0x137   : > { %4266 = vst [vmem:[#allocation12_spill] sm:$0xff] %v4091_v59  ;;  %v1145_v1 = vadd.f32 %v3993_v10, %v1041_v28  ;;  %v1246_v10 = vadd.f32 %v1199_v9, %v4017_v51 }
 0x138   : > { %v3061_v8 = vpop.f32.mrf.mxu0  ;;  %v4093_v13 = vpop.f32.mrf.mxu1 }
 0x139   : > { %4267 = vst [vmem:[#allocation13_spill] sm:$0xff] %v4093_v13  ;;  %v1039_v13 = vadd.f32 %v4019_v57, %v3991_v48  ;;  %v1249_v34 = vadd.f32 %v3034_v12, %v1145_v1  ;;  %v1045_v48 = vadd.f32 %v4029_v37, %v3995_v24  ;;  %v1350_v44 = vadd.f32 %v4023_v39, %v1246_v10 }
 0x13a   : > { %v1407_v32 = vpop.f32.mrf.mxu0  ;;  %v4095_v35 = vpop.f32.mrf.mxu1  ;;  %v1250_v39 = vadd.f32 %v4065_v41, %v4033_v52 }
 0x13b   : > { %4268 = vst [vmem:[#allocation14_spill] sm:$0xff] %v4095_v35  ;;  %v1353_v5 = vadd.f32 %v4025_v54, %v1249_v34  ;;  %v1149_v24 = vadd.f32 %v4001_v43, %v1045_v48 }
 0x13c   : > { %v3062_v50 = vpop.f32.mrf.mxu0  ;;  %v4097_v36 = vpop.f32.mrf.mxu1 }
 0x13d   : > { %4269 = vst [vmem:[#allocation15_spill] sm:$0xff] %v4097_v36  ;;  %v1457_v9 = vadd.f32 %v3062_v50, %v1353_v5 }
 0x13e   : > { %v1410_v29 = vpop.f32.mrf.mxu0  ;;  %v4101_v56 = vpop.f32.mrf.mxu1 }
 0x13f   : > { %4270 = vst [vmem:[#allocation16_spill] sm:$0xff] %v4101_v56 }
 0x140   : > { %v4099_v42 = vpop.f32.mrf.mxu0  ;;  %v4107_v16 = vpop.f32.mrf.mxu1 }
 0x141   : > { %4271 = vst [vmem:[#allocation17_spill] sm:$0xff] %v4107_v16  ;;  %v1143_v16 = vadd.f32 %v3997_v23, %v1039_v13  ;;  %v1352_v23 = vadd.f32 %v4021_v46, %v1248_v40  ;;  %v1253_v46 = vadd.f32 %v3038_v22, %v1149_v24  ;;  %v1047_v22 = vadd.f32 %v4051_v47, %v4007_v62 }
 0x142   : > { %v4103_v6 = vpop.f32.mrf.mxu0  ;;  %v4113_v35 = vpop.f32.mrf.mxu1  ;;  %v1354_v40 = vadd.f32 %v4039_v4, %v1250_v39  ;;  %v1256_v4 = vadd.f32 %v4075_v27, %v4043_v18  ;;  %v4275_v18 = vld [vmem:[#allocation7_spill] sm:$0xff]  ;;  %v4283_v39 = vld [vmem:[#allocation6_spill] sm:$0xff] }
 0x143   : > { %4272 = vst [vmem:[#allocation18_spill] sm:$0xff] %v4113_v35  ;;  %v1247_v28 = vadd.f32 %v1202_v19, %v1143_v16  ;;  %v1456_v51 = vadd.f32 %v3061_v8, %v1352_v23  ;;  %v1252_v16 = vadd.f32 %v3037_v25, %v4027_v61  ;;  %v1454_v19 = vadd.f32 %v1407_v32, %v1350_v44 }
 0x144   : > { %v4109_v59 = vpop.f32.mrf.mxu0  ;;  %v4119_v56 = vpop.f32.mrf.mxu1  ;;  %v1049_v8 = vadd.f32 %v4045_v58, %v4003_v17  ;;  %v1357_v17 = vadd.f32 %v4041_v45, %v1253_v46  ;;  %v1458_v48 = vadd.f32 %v4103_v6, %v1354_v40  ;;  %v1254_v23 = vadd.f32 %v4079_v63, %v4049_v49  ;;  %v4278_v6 = vld [vmem:[#allocation5_spill] sm:$0xff]  ;;  %v4279_v46 = vld [vmem:[#allocation8_spill] sm:$0xff]  ;;  %v4280_v49 = vld [vmem:[#allocation10_spill] sm:$0xff] }
 0x145   : > { %4273 = vst [vmem:[#allocation19_spill] sm:$0xff] %v4119_v56  ;;  %v1043_v56 = vadd.f32 %v4035_v3, %v3999_v26  ;;  %v1351_v26 = vadd.f32 %v4031_v2, %v1247_v28  ;;  %v1560_v61 = vadd.f32 %v4061_v0, %v1456_v51  ;;  %v1558_v52 = vadd.f32 %v4063_v15, %v1454_v19  ;;  %v4277_v51 = vld [vmem:[#allocation3_spill] sm:$0xff]  ;;  %v4285_v40 = vld [vmem:[#allocation13_spill] sm:$0xff] }
 0x146   : > { %v4116_v36 = vpop.f32.mrf.mxu0  ;;  %v4125_v7 = vpop.f32.mrf.mxu1  ;;  %v1461_v45 = vadd.f32 %v4109_v59, %v1357_v17  ;;  %v1360_v44 = vadd.f32 %v4277_v51, %v1256_v4  ;;  %v4287_v4 = vld [vmem:[#allocation14_spill] sm:$0xff] }
 0x147   : > { %v1147_v54 = vadd.f32 %v4005_v55, %v1043_v56  ;;  %v1455_v13 = vadd.f32 %v1410_v29, %v1351_v26  ;;  %v1561_v55 = vadd.f32 %v4067_v33, %v1457_v9  ;;  %v1356_v56 = vadd.f32 %v4037_v31, %v1252_v16 }
 0x148   : > { %v4121_v20 = vpop.f32.mrf.mxu0  ;;  %v4132_v35 = vpop.f32.mrf.mxu1  ;;  %v1153_v33 = vadd.f32 %v4009_v60, %v1049_v8 }
 0x149   : > { %4274 = vst [vmem:[#allocation20_spill] sm:$0xff] %v4121_v20  ;;  %v1251_v2 = vadd.f32 %v4071_v53, %v1147_v54  ;;  %v1559_v53 = vadd.f32 %v4069_v11, %v1455_v13  ;;  %v1460_v29 = vadd.f32 %v4099_v42, %v1356_v56  ;;  %v1151_v42 = vadd.f32 %v4015_v21, %v1047_v22  ;;  %v4282_v13 = vld [vmem:[#allocation4_spill] sm:$0xff] }
 0x14a   : > { %v4129_v57 = vpop.f32.mrf.mxu0  ;;  %v4141_v1 = vpop.f32.mrf.mxu1  ;;  %v1562_v54 = vadd.f32 %v4279_v46, %v1458_v48  ;;  %v1358_v8 = vadd.f32 %v4282_v13, %v1254_v23 }
 0x14b   : > { %v1355_v62 = vadd.f32 %v4047_v30, %v1251_v2  ;;  %v1257_v30 = vadd.f32 %v4083_v38, %v1153_v33  ;;  %v1255_v5 = vadd.f32 %v4087_v14, %v1151_v42  ;;  %v1564_v27 = vadd.f32 %v4275_v18, %v1460_v29  ;;  %v4276_v38 = vld [vmem:[#allocation9_spill] sm:$0xff]  ;;  %v4284_v33 = vld [vmem:[#allocation11_spill] sm:$0xff] }
 0x14c   : > { %v4136_v20 = vpop.f32.mrf.mxu0  ;;  %v4148_v3 = vpop.f32.mrf.mxu1  ;;  %v1565_v21 = vadd.f32 %v4276_v38, %v1461_v45 }
 0x14d   : > { %v1459_v10 = vadd.f32 %v4116_v36, %v1355_v62  ;;  %v1361_v9 = vadd.f32 %v4278_v6, %v1257_v30  ;;  %v1359_v2 = vadd.f32 %v4283_v39, %v1255_v5  ;;  %v4288_v5 = vld [vmem:[#allocation15_spill] sm:$0xff] }
 0x14e   : > { %v4144_v37 = vpop.f32.mrf.mxu0  ;;  %v4152_v43 = vpop.f32.mrf.mxu1 }
 0x14f   : > { %v1563_v63 = vadd.f32 %v4280_v49, %v1459_v10 }
 0x150   : > { %v3089_v12 = vpop.f32.mrf.mxu0  ;;  %v4161_v25 = vpop.f32.mrf.mxu1  ;;  %v4281_v14 = vld [vmem:[#allocation20_spill] sm:$0xff] }
 0x151   : > { %v1664_v32 = vadd.f32 %v3089_v12, %v1560_v61  ;;  %v1464_v19 = vadd.f32 %v4281_v14, %v1360_v44  ;;  %v1465_v61 = vadd.f32 %v4136_v20, %v1361_v9  ;;  %v4291_v44 = vld [vmem:[#allocation17_spill] sm:$0xff] }
 0x152   : > { %v1615_v50 = vpop.f32.mrf.mxu0  ;;  %v4169_v0 = vpop.f32.mrf.mxu1  ;;  %v2031_v6 = vadd.f32 %v4132_v35, %v4291_v44 }
 0x153   : > { %v1662_v47 = vadd.f32 %v1615_v50, %v1558_v52  ;;  %v1463_v52 = vadd.f32 %v4144_v37, %v1359_v2  ;;  %v1568_v29 = vadd.f32 %v4284_v33, %v1464_v19  ;;  %v1569_v62 = vadd.f32 %v4285_v40, %v1465_v61 }
 0x154   : > { %v3090_v58 = vpop.f32.mrf.mxu0  ;;  %v4181_v60 = vpop.f32.mrf.mxu1 }
 0x155   : > { %v1665_v41 = vadd.f32 %v3090_v58, %v1561_v55 }
 0x156   : > { %v1618_v31 = vpop.f32.mrf.mxu0  ;;  %v4190_v28 = vpop.f32.mrf.mxu1 }
 0x157   : > { %v2844_v15 = vpack.c.bf16 %v1665_v41, %v1664_v32  ;;  %v1663_v11 = vadd.f32 %v1618_v31, %v1559_v53  ;;  %v1462_v32 = vadd.f32 %v4129_v57, %v1358_v8  ;;  %v1567_v57 = vadd.f32 %v4287_v4, %v1463_v52 }
 0x158   : > { %v3093_v34 = vpop.f32.mrf.mxu0  ;;  %v3128_v26 = vpop.f32.mrf.mxu1 }
 0x159   : > { %2876 = vst [vmem:[%s4178_s29 + $0x8] sm:$0xff] %v2844_v15   ;;  %v2839_v59 = vpack.c.bf16 %v1663_v11, %v1662_v47  ;;  %v1668_v16 = vadd.f32 %v3093_v34, %v1564_v27  ;;  %v4286_v47 = vld [vmem:[#allocation12_spill] sm:$0xff] }
 0x15a   : > { %v1631_v24 = vpop.f32.mrf.mxu0  ;;  %v2213_v58 = vpop.f32.mrf.mxu1  ;;  %v1566_v15 = vadd.f32 %v4286_v47, %v1462_v32 }
 0x15b   : > { %2840 = vst [vmem:[%s4178_s29] sm:$0xff] %v2839_v59   ;;  %v1666_v55 = vadd.f32 %v1631_v24, %v1562_v54  ;;  %v4289_v24 = vld [vmem:[#allocation19_spill] sm:$0xff] }
 0x15c   : > { %v3094_v36 = vpop.f32.mrf.mxu0  ;;  %v3139_v20 = vpop.f32.mrf.mxu1  ;;  %v2028_v18 = vadd.f32 %v4289_v24, %v4288_v5 }
 0x15d   : > { %v1669_v12 = vadd.f32 %v3094_v36, %v1565_v21  ;;  %v4290_v21 = vld [vmem:[#allocation16_spill] sm:$0xff] }
 0x15e   : > { %v1634_v50 = vpop.f32.mrf.mxu0  ;;  %v2336_v10 = vpop.f32.mrf.mxu1  ;;  %v2020_v51 = vadd.f32 %v4125_v7, %v4290_v21  ;;  %v2101_v9 = vadd.f32 %v4148_v3, %v2028_v18 }
 0x15f   : > { %v2854_v22 = vpack.c.bf16 %v1669_v12, %v1668_v16  ;;  %v1667_v56 = vadd.f32 %v1634_v50, %v1563_v63  ;;  %v4292_v16 = vld [vmem:[#allocation18_spill] sm:$0xff]  ;;  %v2102_v12 = vadd.f32 %v4161_v25, %v2031_v6 }
 0x160   : > { %v3097_v17 = vpop.f32.mrf.mxu0  ;;  %v3140_v38 = vpop.f32.mrf.mxu1  ;;  %v2023_v46 = vadd.f32 %v4141_v1, %v4292_v16  ;;  %v2099_v54 = vadd.f32 %v4152_v43, %v2020_v51 }
 0x161   : > { %2878 = vst [vmem:[%s4178_s29 + $0x18] sm:$0xff] %v2854_v22   ;;  %v2849_v41 = vpack.c.bf16 %v1667_v56, %v1666_v55  ;;  %v1672_v45 = vadd.f32 %v3097_v17, %v1568_v29 }
 0x162   : > { %v1647_v53 = vpop.f32.mrf.mxu0  ;;  %v2339_v14 = vpop.f32.mrf.mxu1  ;;  %v2100_v19 = vadd.f32 %v4169_v0, %v2023_v46 }
 0x163   : > { %2877 = vst [vmem:[%s4178_s29 + $0x10] sm:$0xff] %v2849_v41   ;;  %v1670_v37 = vadd.f32 %v1647_v53, %v1566_v15 }
 0x164   : > { %v3098_v31 = vpop.f32.mrf.mxu0  ;;  %v3151_v2 = vpop.f32.mrf.mxu1 }
 0x165   : > { %v1673_v11 = vadd.f32 %v3098_v31, %v1569_v62 }
 0x166   : > { %v1650_v30 = vpop.f32.mrf.mxu0  ;;  %v2462_v56 = vpop.f32.mrf.mxu1 }
 0x167   : > { %v2864_v42 = vpack.c.bf16 %v1673_v11, %v1672_v45  ;;  %v1671_v34 = vadd.f32 %v1650_v30, %v1567_v57 }
 0x168   : > { %v3121_v48 = vpop.f32.mrf.mxu0 }
 0x169   : > { %2880 = vst [vmem:[%s4178_s29 + $0x28] sm:$0xff] %v2864_v42   ;;  %v2859_v59 = vpack.c.bf16 %v1671_v34, %v1670_v37  ;;  %v2164_v49 = vadd.f32 %v3121_v48, %v2101_v9 }
 0x16a   : > { %v2147_v23 = vpop.f32.mrf.mxu0 }
 0x16b   : > { %2879 = vst [vmem:[%s4178_s29 + $0x20] sm:$0xff] %v2859_v59   ;;  %v2162_v13 = vadd.f32 %v2147_v23, %v2099_v54  ;;  %v2227_v35 = vadd.f32 %v4181_v60, %v2164_v49  ;;  %v3152_v60 = vpop.f32.mrf.mxu1 }
 0x16c   : > { %v3122_v27 = vpop.f32.mrf.mxu0 }
 0x16d   : > { %v2165_v7 = vadd.f32 %v3122_v27, %v2102_v12  ;;  %v2225_v1 = vadd.f32 %v4190_v28, %v2162_v13 }
 0x16e   : > { %v2150_v36 = vpop.f32.mrf.mxu0 }
 0x16f   : > { %v2163_v39 = vadd.f32 %v2150_v36, %v2100_v19  ;;  %v2228_v61 = vadd.f32 %v3128_v26, %v2165_v7 }
 0x170   : > { %v3133_v63 = vpop.f32.mrf.mxu0 }
 0x171   : > { %v2290_v50 = vadd.f32 %v3133_v63, %v2227_v35  ;;  %v2226_v22 = vadd.f32 %v2213_v58, %v2163_v39  ;;  %v2465_v58 = vpop.f32.mrf.mxu1 }
 0x172   : > { %v2273_v8 = vpop.f32.mrf.mxu0 }
 0x173   : > { %v2288_v55 = vadd.f32 %v2273_v8, %v2225_v1  ;;  %v2353_v0 = vadd.f32 %v3139_v20, %v2290_v50 }
 0x174   : > { %v3134_v3 = vpop.f32.mrf.mxu0 }
 0x175   : > { %v2291_v25 = vadd.f32 %v3134_v3, %v2228_v61  ;;  %v2351_v53 = vadd.f32 %v2336_v10, %v2288_v55 }
 0x176   : > { %v2276_v43 = vpop.f32.mrf.mxu0 }
 0x177   : > { %v2289_v32 = vadd.f32 %v2276_v43, %v2226_v22  ;;  %v2354_v33 = vadd.f32 %v3140_v38, %v2291_v25 }
 0x178   : > { %v3145_v17 = vpop.f32.mrf.mxu0 }
 0x179   : > { %v2416_v41 = vadd.f32 %v3145_v17, %v2353_v0  ;;  %v2352_v28 = vadd.f32 %v2339_v14, %v2289_v32 }
 0x17a   : > { %v2399_v52 = vpop.f32.mrf.mxu0 }
 0x17b   : > { %v2414_v40 = vadd.f32 %v2399_v52, %v2351_v53  ;;  %v2479_v31 = vadd.f32 %v3151_v2, %v2416_v41 }
 0x17c   : > { %v3146_v29 = vpop.f32.mrf.mxu0 }
 0x17d   : > { %v2417_v62 = vadd.f32 %v3146_v29, %v2354_v33  ;;  %v2477_v15 = vadd.f32 %v2462_v56, %v2414_v40 }
 0x17e   : > { %v2402_v26 = vpop.f32.mrf.mxu0 }
 0x17f   : > { %v2480_v45 = vadd.f32 %v3152_v60, %v2417_v62  ;;  %v2415_v47 = vadd.f32 %v2402_v26, %v2352_v28 }
 0x181   : > { %v2874_v11 = vpack.c.bf16 %v2480_v45, %v2479_v31  ;;  %v2478_v4 = vadd.f32 %v2465_v58, %v2415_v47 }
 0x183   : > { %2882 = vst [vmem:[%s4178_s29 + $0x38] sm:$0xff] %v2874_v11   ;;  %v2869_v20 = vpack.c.bf16 %v2478_v4, %v2477_v15 }
 0x185   : > { %2881 = vst [vmem:[%s4178_s29 + $0x30] sm:$0xff] %v2869_v20  }
 0x186 PF: > { %s14_s19 = sadd.s32 1, %s3264_s19   ;;  %s4293_s15 = smov %s3256_s17 }
 0x187   : > { %p11_p10 = scmp.ge.s32.totalorder %s14_s19, 6   ;;  %s4294_s16 = smov %s3260_s18 }
 0x188   : > { %s4295_s17 = smov %s4298_s20  ;;  %s4296_s18 = smov %s4302_s21 }
 0x189   :  { %13 = sbr.rel (!%p11_p10) target bundleno = 3 (0x3), region = 82 }

</bundles_post_ra>
